<compile_context>
chip_gen: v6e
topology: v6e:2x2x1
jax: 0.10.0
libtpu: 0.0.40
codegen_flags: <defaults>
</compile_context>

<pallas_src>
import jax
import jax.numpy as jnp
import numpy as np
from jax import lax
from jax.experimental import pallas as pl
from jax.experimental.pallas import tpu as pltpu


def _residual_block_kernel(x_ref, w_ref, sh_ref, out_ref):
    """x_ref/out_ref: (B, C, L); w_ref: (3 layers, 3 taps, C, C); sh_ref: (3, C, 1) f32."""
    B, C, L = x_ref.shape
    cdt = x_ref.dtype

    # Lane-position masks for the zero padding (padding=1) at sequence edges.  Built once;
    # the wrap-around lanes of the rolls land exactly on these masked positions.
    col = lax.broadcasted_iota(jnp.int32, (C, L), 1)
    is_first = col == 0
    is_last = col == L - 1

    def conv_bn_relu(h, layer):
        # h: (C, L) in compute dtype.  +/-1 taps via lane rotation (XLU) + edge masks.
        h_prev = jnp.where(is_first, 0.0, pltpu.roll(h, 1, axis=1))        # h[:, t-1]
        h_next = jnp.where(is_last, 0.0, pltpu.roll(h, L - 1, axis=1))     # h[:, t+1]
        # Three K=C MXU passes accumulated in f32 (BN scale already folded into the weights).
        y = jnp.dot(w_ref[layer, 0], h_prev, preferred_element_type=jnp.float32)
        y = y + jnp.dot(w_ref[layer, 1], h, preferred_element_type=jnp.float32)
        y = y + jnp.dot(w_ref[layer, 2], h_next, preferred_element_type=jnp.float32)
        return jnp.maximum(y + sh_ref[layer], 0.0)                          # shift + ReLU (f32)

    for b in range(B):                         # static unroll over sequences in this block
        h = x_ref[b]                           # (C, L) compute dtype
        for i in range(3):                     # static unroll over the 3 ConvBlocks
            y = conv_bn_relu(h, i)             # f32 (C, L)
            h = y.astype(cdt)                  # low-precision feed for the next layer's matmul
        # Identity skip (stride=1, channel_in == channel); Dropout is identity in eval mode.
        # x is re-read here (not kept live across the layers) to keep vreg pressure low.
        out_ref[b] = (y + x_ref[b].astype(jnp.float32)).astype(out_ref.dtype)


def pack_params(raw, dtype=jnp.bfloat16, eps=1e-5):
    """Fold conv bias + eval-mode BN into the conv weights / a per-channel shift.

    Returns:
      w:     (3 layers, 3 taps, C_out, C_in) in `dtype`, with BN scale folded in
             (tap k multiplies x[t + k - 1], matching Conv1d(k=3, padding=1)).
      shift: (3 layers, C, 1) float32 = beta + (conv_bias - running_mean) * scale.
    """
    w_list, sh_list = [], []
    for i in (1, 2, 3):
        cw = raw[f"cw{i}"]                                            # (C_out, C_in, 3)
        scale = raw[f"g{i}"] / jnp.sqrt(raw[f"v{i}"] + eps)           # (C_out,)
        shift = raw[f"b{i}"] + (raw[f"cb{i}"] - raw[f"m{i}"]) * scale
        w_taps = jnp.transpose(cw, (2, 0, 1)) * scale[None, :, None]  # (3, C_out, C_in)
        w_list.append(w_taps.astype(dtype))
        sh_list.append(shift.reshape(-1, 1).astype(jnp.float32))
    return {"w": jnp.stack(w_list), "shift": jnp.stack(sh_list)}


def residual_block(x_ncl, params, *, seqs_per_block=1):
    """x_ncl: (N, C, L) PyTorch layout.  Returns (N, C, L) in the packed-params dtype."""
    N, C_in, L = x_ncl.shape
    C = params["w"].shape[-2]
    assert C_in == C, "identity skip path requires channel_in == channel (stride=1)"
    bn = seqs_per_block
    assert N % bn == 0, "seqs_per_block must divide the batch size"

    cdt = params["w"].dtype
    x_in = x_ncl.astype(cdt)      # dtype cast only -- no wrapper-side transpose / HBM reshuffle

    # Per-block buffers (double-buffered by Pallas): x + out blocks are bn*C*L elements each,
    # plus the small weight/shift blocks -- far below the v7x 32 MiB scoped-VMEM default.
    out = pl.pallas_call(
        _residual_block_kernel,
        out_shape=jax.ShapeDtypeStruct((N, C, L), cdt),
        grid_spec=pltpu.PrefetchScalarGridSpec(
            num_scalar_prefetch=0,
            grid=(N // bn,),
            in_specs=[
                pl.BlockSpec((bn, C, L), lambda n: (n, 0, 0)),          # activations (lane = L)
                pl.BlockSpec((3, 3, C, C), lambda n: (0, 0, 0, 0)),     # tap weights (resident)
                pl.BlockSpec((3, C, 1), lambda n: (0, 0, 0)),           # folded BN shift
            ],
            out_specs=pl.BlockSpec((bn, C, L), lambda n: (n, 0, 0)),
        ),
        compiler_params=pltpu.CompilerParams(
            dimension_semantics=("parallel",),      # shards batch tiles across v7x's 2 TCs
        ),
    )(x_in, params["w"], params["shift"])
    return out


# ---------------- pure-JAX reference (independent code path) ----------------

def _conv1d_ref(x, w, b):
    y = lax.conv_general_dilated(x, w, window_strides=(1,), padding=[(1, 1)],
                                 dimension_numbers=("NCH", "OIH", "NCH"))
    return y + b[None, :, None]


def _bn_relu_ref(y, gamma, beta, mean, var, eps=1e-5):
    yn = (y - mean[None, :, None]) / jnp.sqrt(var[None, :, None] + eps)
    yn = yn * gamma[None, :, None] + beta[None, :, None]
    return jnp.maximum(yn, 0.0)


def residual_block_ref(x, raw):
    h = x
    for i in (1, 2, 3):
        h = _conv1d_ref(h, raw[f"cw{i}"], raw[f"cb{i}"])
        h = _bn_relu_ref(h, raw[f"g{i}"], raw[f"b{i}"], raw[f"m{i}"], raw[f"v{i}"])
    return h + x  # stride=1 -> identity skip


# ---------------------------------- main ------------------------------------

if __name__ == "__main__":
    # ResidualBlock defaults: channel_in = channel = 32, stride = 1.
    N, C, L = 8, 32, 128   # L = 128 -> lane-dense tiles; grid = N / seqs_per_block = 4 steps

    key = jax.random.PRNGKey(0)
    keys = iter(jax.random.split(key, 19))

    raw = {}
    for i in (1, 2, 3):
        raw[f"cw{i}"] = 0.1 * jax.random.normal(next(keys), (C, C, 3), jnp.float32)
        raw[f"cb{i}"] = 0.1 * jax.random.normal(next(keys), (C,), jnp.float32)
        raw[f"g{i}"] = 0.5 + jax.random.uniform(next(keys), (C,), jnp.float32)
        raw[f"b{i}"] = 0.1 * jax.random.normal(next(keys), (C,), jnp.float32)
        raw[f"m{i}"] = 0.1 * jax.random.normal(next(keys), (C,), jnp.float32)
        raw[f"v{i}"] = 0.5 + jax.random.uniform(next(keys), (C,), jnp.float32)
    x = jax.random.normal(next(keys), (N, C, L), jnp.float32)

    ref = jax.block_until_ready(residual_block_ref(x, raw))

    # f32 path: tight check against the XLA conv reference.
    out_f32 = jax.block_until_ready(
        residual_block(x, pack_params(raw, dtype=jnp.float32), seqs_per_block=2))
    np.testing.assert_allclose(np.asarray(out_f32), np.asarray(ref), rtol=1e-4, atol=1e-4)

    # bf16 I/O path (halves HBM traffic for this memory-bound kernel): loose check.
    out_bf16 = jax.block_until_ready(
        residual_block(x, pack_params(raw, dtype=jnp.bfloat16), seqs_per_block=2))
    np.testing.assert_allclose(np.asarray(out_bf16.astype(jnp.float32)), np.asarray(ref),
                               rtol=5e-2, atol=1e-1)

    print("KERNEL_OK")
</pallas_src>

<mosaic_0001>
module attributes {stable_mosaic.version = 11 : i64} {
  func.func @_residual_block_kernel(%arg0: i32, %arg1: memref<2x32x128xf32, #tpu.memory_space<vmem>>, %arg2: memref<3x3x32x32xf32, #tpu.memory_space<vmem>>, %arg3: memref<3x32x1xf32, #tpu.memory_space<vmem>>, %arg4: memref<2x32x128xf32, #tpu.memory_space<vmem>>) attributes {dimension_semantics = [#tpu.dimension_semantics<parallel>], iteration_bounds = array<i64: 4>, scalar_prefetch = 0 : i64, scratch_operands = 0 : i64, tpu.core_type = #tpu.core_type<tc>, window_params = [{transform_indices = @transform_0, window_bounds = array<i64: 2, 32, 128>}, {pipeline_mode = #tpu.pipeline_mode<synchronous>, transform_indices = @transform_1, window_bounds = array<i64: 3, 3, 32, 32>}, {pipeline_mode = #tpu.pipeline_mode<synchronous>, transform_indices = @transform_2, window_bounds = array<i64: 3, 32, 1>}, {transform_indices = @transform_3, window_bounds = array<i64: 2, 32, 128>}]} {
    %0 = tpu.iota {dimensions = array<i32: 1>} : vector<32x128xi32>
    %c0_i32 = arith.constant 0 : i32
    %1 = vector.broadcast %c0_i32 : i32 to vector<32x128xi32>
    %2 = arith.cmpi eq, %0, %1 : vector<32x128xi32>
    %c127_i32 = arith.constant 127 : i32
    %3 = vector.broadcast %c127_i32 : i32 to vector<32x128xi32>
    %4 = arith.cmpi eq, %0, %3 : vector<32x128xi32>
    %c0 = arith.constant 0 : index
    %c0_0 = arith.constant 0 : index
    %c0_1 = arith.constant 0 : index
    %5 = vector.load %arg1[%c0, %c0_0, %c0_1] : memref<2x32x128xf32, #tpu.memory_space<vmem>>, vector<1x32x128xf32>
    %6 = vector.shape_cast %5 : vector<1x32x128xf32> to vector<32x128xf32>
    %c1_i32 = arith.constant 1 : i32
    %7 = tpu.dynamic_rotate %6 by %c1_i32 dim 1 : vector<32x128xf32>, i32 -> vector<32x128xf32>
    %cst = arith.constant 0.000000e+00 : f32
    %8 = vector.broadcast %cst : f32 to vector<32x128xf32>
    %9 = arith.select %2, %8, %7 : vector<32x128xi1>, vector<32x128xf32>
    %c127_i32_2 = arith.constant 127 : i32
    %10 = tpu.dynamic_rotate %6 by %c127_i32_2 dim 1 : vector<32x128xf32>, i32 -> vector<32x128xf32>
    %cst_3 = arith.constant 0.000000e+00 : f32
    %11 = vector.broadcast %cst_3 : f32 to vector<32x128xf32>
    %12 = arith.select %4, %11, %10 : vector<32x128xi1>, vector<32x128xf32>
    %c0_4 = arith.constant 0 : index
    %c0_5 = arith.constant 0 : index
    %c0_6 = arith.constant 0 : index
    %c0_7 = arith.constant 0 : index
    %13 = vector.load %arg2[%c0_4, %c0_5, %c0_6, %c0_7] : memref<3x3x32x32xf32, #tpu.memory_space<vmem>>, vector<1x1x32x32xf32>
    %14 = vector.shape_cast %13 : vector<1x1x32x32xf32> to vector<32x32xf32>
    %cst_8 = arith.constant dense<0.000000e+00> : vector<32x128xf32>
    %15 = tpu.matmul %14, %9, %cst_8 {dimension_numbers = #tpu.dot_dimension_numbers<[1], [0], [0], [1], [0, 0, 1, 1], [], []>} : vector<32x32xf32>, vector<32x128xf32>, vector<32x128xf32> -> vector<32x128xf32>
    %c0_9 = arith.constant 0 : index
    %c1 = arith.constant 1 : index
    %c0_10 = arith.constant 0 : index
    %c0_11 = arith.constant 0 : index
    %16 = vector.load %arg2[%c0_9, %c1, %c0_10, %c0_11] : memref<3x3x32x32xf32, #tpu.memory_space<vmem>>, vector<1x1x32x32xf32>
    %17 = vector.shape_cast %16 : vector<1x1x32x32xf32> to vector<32x32xf32>
    %cst_12 = arith.constant dense<0.000000e+00> : vector<32x128xf32>
    %18 = tpu.matmul %17, %6, %cst_12 {dimension_numbers = #tpu.dot_dimension_numbers<[1], [0], [0], [1], [0, 0, 1, 1], [], []>} : vector<32x32xf32>, vector<32x128xf32>, vector<32x128xf32> -> vector<32x128xf32>
    %19 = arith.addf %15, %18 : vector<32x128xf32>
    %c0_13 = arith.constant 0 : index
    %c2 = arith.constant 2 : index
    %c0_14 = arith.constant 0 : index
    %c0_15 = arith.constant 0 : index
    %20 = vector.load %arg2[%c0_13, %c2, %c0_14, %c0_15] : memref<3x3x32x32xf32, #tpu.memory_space<vmem>>, vector<1x1x32x32xf32>
    %21 = vector.shape_cast %20 : vector<1x1x32x32xf32> to vector<32x32xf32>
    %cst_16 = arith.constant dense<0.000000e+00> : vector<32x128xf32>
    %22 = tpu.matmul %21, %12, %cst_16 {dimension_numbers = #tpu.dot_dimension_numbers<[1], [0], [0], [1], [0, 0, 1, 1], [], []>} : vector<32x32xf32>, vector<32x128xf32>, vector<32x128xf32> -> vector<32x128xf32>
    %23 = arith.addf %19, %22 : vector<32x128xf32>
    %c0_17 = arith.constant 0 : index
    %c0_18 = arith.constant 0 : index
    %c0_19 = arith.constant 0 : index
    %24 = vector.load %arg3[%c0_17, %c0_18, %c0_19] : memref<3x32x1xf32, #tpu.memory_space<vmem>>, vector<1x32x1xf32>
    %25 = vector.shape_cast %24 : vector<1x32x1xf32> to vector<32x1xf32>
    %26 = vector.broadcast %25 : vector<32x1xf32> to vector<32x128xf32>
    %27 = arith.addf %23, %26 : vector<32x128xf32>
    %cst_20 = arith.constant 0.000000e+00 : f32
    %28 = vector.broadcast %cst_20 : f32 to vector<32x128xf32>
    %29 = arith.maximumf %27, %28 : vector<32x128xf32>
    %c1_i32_21 = arith.constant 1 : i32
    %30 = tpu.dynamic_rotate %29 by %c1_i32_21 dim 1 : vector<32x128xf32>, i32 -> vector<32x128xf32>
    %cst_22 = arith.constant 0.000000e+00 : f32
    %31 = vector.broadcast %cst_22 : f32 to vector<32x128xf32>
    %32 = arith.select %2, %31, %30 : vector<32x128xi1>, vector<32x128xf32>
    %c127_i32_23 = arith.constant 127 : i32
    %33 = tpu.dynamic_rotate %29 by %c127_i32_23 dim 1 : vector<32x128xf32>, i32 -> vector<32x128xf32>
    %cst_24 = arith.constant 0.000000e+00 : f32
    %34 = vector.broadcast %cst_24 : f32 to vector<32x128xf32>
    %35 = arith.select %4, %34, %33 : vector<32x128xi1>, vector<32x128xf32>
    %c1_25 = arith.constant 1 : index
    %c0_26 = arith.constant 0 : index
    %c0_27 = arith.constant 0 : index
    %c0_28 = arith.constant 0 : index
    %36 = vector.load %arg2[%c1_25, %c0_26, %c0_27, %c0_28] : memref<3x3x32x32xf32, #tpu.memory_space<vmem>>, vector<1x1x32x32xf32>
    %37 = vector.shape_cast %36 : vector<1x1x32x32xf32> to vector<32x32xf32>
    %cst_29 = arith.constant dense<0.000000e+00> : vector<32x128xf32>
    %38 = tpu.matmul %37, %32, %cst_29 {dimension_numbers = #tpu.dot_dimension_numbers<[1], [0], [0], [1], [0, 0, 1, 1], [], []>} : vector<32x32xf32>, vector<32x128xf32>, vector<32x128xf32> -> vector<32x128xf32>
    %c1_30 = arith.constant 1 : index
    %c1_31 = arith.constant 1 : index
    %c0_32 = arith.constant 0 : index
    %c0_33 = arith.constant 0 : index
    %39 = vector.load %arg2[%c1_30, %c1_31, %c0_32, %c0_33] : memref<3x3x32x32xf32, #tpu.memory_space<vmem>>, vector<1x1x32x32xf32>
    %40 = vector.shape_cast %39 : vector<1x1x32x32xf32> to vector<32x32xf32>
    %cst_34 = arith.constant dense<0.000000e+00> : vector<32x128xf32>
    %41 = tpu.matmul %40, %29, %cst_34 {dimension_numbers = #tpu.dot_dimension_numbers<[1], [0], [0], [1], [0, 0, 1, 1], [], []>} : vector<32x32xf32>, vector<32x128xf32>, vector<32x128xf32> -> vector<32x128xf32>
    %42 = arith.addf %38, %41 : vector<32x128xf32>
    %c1_35 = arith.constant 1 : index
    %c2_36 = arith.constant 2 : index
    %c0_37 = arith.constant 0 : index
    %c0_38 = arith.constant 0 : index
    %43 = vector.load %arg2[%c1_35, %c2_36, %c0_37, %c0_38] : memref<3x3x32x32xf32, #tpu.memory_space<vmem>>, vector<1x1x32x32xf32>
    %44 = vector.shape_cast %43 : vector<1x1x32x32xf32> to vector<32x32xf32>
    %cst_39 = arith.constant dense<0.000000e+00> : vector<32x128xf32>
    %45 = tpu.matmul %44, %35, %cst_39 {dimension_numbers = #tpu.dot_dimension_numbers<[1], [0], [0], [1], [0, 0, 1, 1], [], []>} : vector<32x32xf32>, vector<32x128xf32>, vector<32x128xf32> -> vector<32x128xf32>
    %46 = arith.addf %42, %45 : vector<32x128xf32>
    %c1_40 = arith.constant 1 : index
    %c0_41 = arith.constant 0 : index
    %c0_42 = arith.constant 0 : index
    %47 = vector.load %arg3[%c1_40, %c0_41, %c0_42] : memref<3x32x1xf32, #tpu.memory_space<vmem>>, vector<1x32x1xf32>
    %48 = vector.shape_cast %47 : vector<1x32x1xf32> to vector<32x1xf32>
    %49 = vector.broadcast %48 : vector<32x1xf32> to vector<32x128xf32>
    %50 = arith.addf %46, %49 : vector<32x128xf32>
    %cst_43 = arith.constant 0.000000e+00 : f32
    %51 = vector.broadcast %cst_43 : f32 to vector<32x128xf32>
    %52 = arith.maximumf %50, %51 : vector<32x128xf32>
    %c1_i32_44 = arith.constant 1 : i32
    %53 = tpu.dynamic_rotate %52 by %c1_i32_44 dim 1 : vector<32x128xf32>, i32 -> vector<32x128xf32>
    %cst_45 = arith.constant 0.000000e+00 : f32
    %54 = vector.broadcast %cst_45 : f32 to vector<32x128xf32>
    %55 = arith.select %2, %54, %53 : vector<32x128xi1>, vector<32x128xf32>
    %c127_i32_46 = arith.constant 127 : i32
    %56 = tpu.dynamic_rotate %52 by %c127_i32_46 dim 1 : vector<32x128xf32>, i32 -> vector<32x128xf32>
    %cst_47 = arith.constant 0.000000e+00 : f32
    %57 = vector.broadcast %cst_47 : f32 to vector<32x128xf32>
    %58 = arith.select %4, %57, %56 : vector<32x128xi1>, vector<32x128xf32>
    %c2_48 = arith.constant 2 : index
    %c0_49 = arith.constant 0 : index
    %c0_50 = arith.constant 0 : index
    %c0_51 = arith.constant 0 : index
    %59 = vector.load %arg2[%c2_48, %c0_49, %c0_50, %c0_51] : memref<3x3x32x32xf32, #tpu.memory_space<vmem>>, vector<1x1x32x32xf32>
    %60 = vector.shape_cast %59 : vector<1x1x32x32xf32> to vector<32x32xf32>
    %cst_52 = arith.constant dense<0.000000e+00> : vector<32x128xf32>
    %61 = tpu.matmul %60, %55, %cst_52 {dimension_numbers = #tpu.dot_dimension_numbers<[1], [0], [0], [1], [0, 0, 1, 1], [], []>} : vector<32x32xf32>, vector<32x128xf32>, vector<32x128xf32> -> vector<32x128xf32>
    %c2_53 = arith.constant 2 : index
    %c1_54 = arith.constant 1 : index
    %c0_55 = arith.constant 0 : index
    %c0_56 = arith.constant 0 : index
    %62 = vector.load %arg2[%c2_53, %c1_54, %c0_55, %c0_56] : memref<3x3x32x32xf32, #tpu.memory_space<vmem>>, vector<1x1x32x32xf32>
    %63 = vector.shape_cast %62 : vector<1x1x32x32xf32> to vector<32x32xf32>
    %cst_57 = arith.constant dense<0.000000e+00> : vector<32x128xf32>
    %64 = tpu.matmul %63, %52, %cst_57 {dimension_numbers = #tpu.dot_dimension_numbers<[1], [0], [0], [1], [0, 0, 1, 1], [], []>} : vector<32x32xf32>, vector<32x128xf32>, vector<32x128xf32> -> vector<32x128xf32>
    %65 = arith.addf %61, %64 : vector<32x128xf32>
    %c2_58 = arith.constant 2 : index
    %c2_59 = arith.constant 2 : index
    %c0_60 = arith.constant 0 : index
    %c0_61 = arith.constant 0 : index
    %66 = vector.load %arg2[%c2_58, %c2_59, %c0_60, %c0_61] : memref<3x3x32x32xf32, #tpu.memory_space<vmem>>, vector<1x1x32x32xf32>
    %67 = vector.shape_cast %66 : vector<1x1x32x32xf32> to vector<32x32xf32>
    %cst_62 = arith.constant dense<0.000000e+00> : vector<32x128xf32>
    %68 = tpu.matmul %67, %58, %cst_62 {dimension_numbers = #tpu.dot_dimension_numbers<[1], [0], [0], [1], [0, 0, 1, 1], [], []>} : vector<32x32xf32>, vector<32x128xf32>, vector<32x128xf32> -> vector<32x128xf32>
    %69 = arith.addf %65, %68 : vector<32x128xf32>
    %c2_63 = arith.constant 2 : index
    %c0_64 = arith.constant 0 : index
    %c0_65 = arith.constant 0 : index
    %70 = vector.load %arg3[%c2_63, %c0_64, %c0_65] : memref<3x32x1xf32, #tpu.memory_space<vmem>>, vector<1x32x1xf32>
    %71 = vector.shape_cast %70 : vector<1x32x1xf32> to vector<32x1xf32>
    %72 = vector.broadcast %71 : vector<32x1xf32> to vector<32x128xf32>
    %73 = arith.addf %69, %72 : vector<32x128xf32>
    %cst_66 = arith.constant 0.000000e+00 : f32
    %74 = vector.broadcast %cst_66 : f32 to vector<32x128xf32>
    %75 = arith.maximumf %73, %74 : vector<32x128xf32>
    %c0_67 = arith.constant 0 : index
    %c0_68 = arith.constant 0 : index
    %c0_69 = arith.constant 0 : index
    %76 = vector.load %arg1[%c0_67, %c0_68, %c0_69] : memref<2x32x128xf32, #tpu.memory_space<vmem>>, vector<1x32x128xf32>
    %77 = vector.shape_cast %76 : vector<1x32x128xf32> to vector<32x128xf32>
    %78 = arith.addf %75, %77 : vector<32x128xf32>
    %c0_70 = arith.constant 0 : index
    %c0_71 = arith.constant 0 : index
    %c0_72 = arith.constant 0 : index
    %79 = vector.load %arg4[%c0_70, %c0_71, %c0_72] : memref<2x32x128xf32, #tpu.memory_space<vmem>>, vector<1x32x128xf32>
    %80 = vector.shape_cast %79 : vector<1x32x128xf32> to vector<32x128xf32>
    %81 = vector.shape_cast %78 : vector<32x128xf32> to vector<1x32x128xf32>
    tpu.vector_store %arg4[%c0_70, %c0_71, %c0_72], %81 {strides = array<i32>} : memref<2x32x128xf32, #tpu.memory_space<vmem>>, vector<1x32x128xf32>,
    %c1_73 = arith.constant 1 : index
    %c0_74 = arith.constant 0 : index
    %c0_75 = arith.constant 0 : index
    %82 = vector.load %arg1[%c1_73, %c0_74, %c0_75] : memref<2x32x128xf32, #tpu.memory_space<vmem>>, vector<1x32x128xf32>
    %83 = vector.shape_cast %82 : vector<1x32x128xf32> to vector<32x128xf32>
    %c1_i32_76 = arith.constant 1 : i32
    %84 = tpu.dynamic_rotate %83 by %c1_i32_76 dim 1 : vector<32x128xf32>, i32 -> vector<32x128xf32>
    %cst_77 = arith.constant 0.000000e+00 : f32
    %85 = vector.broadcast %cst_77 : f32 to vector<32x128xf32>
    %86 = arith.select %2, %85, %84 : vector<32x128xi1>, vector<32x128xf32>
    %c127_i32_78 = arith.constant 127 : i32
    %87 = tpu.dynamic_rotate %83 by %c127_i32_78 dim 1 : vector<32x128xf32>, i32 -> vector<32x128xf32>
    %cst_79 = arith.constant 0.000000e+00 : f32
    %88 = vector.broadcast %cst_79 : f32 to vector<32x128xf32>
    %89 = arith.select %4, %88, %87 : vector<32x128xi1>, vector<32x128xf32>
    %c0_80 = arith.constant 0 : index
    %c0_81 = arith.constant 0 : index
    %c0_82 = arith.constant 0 : index
    %c0_83 = arith.constant 0 : index
    %90 = vector.load %arg2[%c0_80, %c0_81, %c0_82, %c0_83] : memref<3x3x32x32xf32, #tpu.memory_space<vmem>>, vector<1x1x32x32xf32>
    %91 = vector.shape_cast %90 : vector<1x1x32x32xf32> to vector<32x32xf32>
    %cst_84 = arith.constant dense<0.000000e+00> : vector<32x128xf32>
    %92 = tpu.matmul %91, %86, %cst_84 {dimension_numbers = #tpu.dot_dimension_numbers<[1], [0], [0], [1], [0, 0, 1, 1], [], []>} : vector<32x32xf32>, vector<32x128xf32>, vector<32x128xf32> -> vector<32x128xf32>
    %c0_85 = arith.constant 0 : index
    %c1_86 = arith.constant 1 : index
    %c0_87 = arith.constant 0 : index
    %c0_88 = arith.constant 0 : index
    %93 = vector.load %arg2[%c0_85, %c1_86, %c0_87, %c0_88] : memref<3x3x32x32xf32, #tpu.memory_space<vmem>>, vector<1x1x32x32xf32>
    %94 = vector.shape_cast %93 : vector<1x1x32x32xf32> to vector<32x32xf32>
    %cst_89 = arith.constant dense<0.000000e+00> : vector<32x128xf32>
    %95 = tpu.matmul %94, %83, %cst_89 {dimension_numbers = #tpu.dot_dimension_numbers<[1], [0], [0], [1], [0, 0, 1, 1], [], []>} : vector<32x32xf32>, vector<32x128xf32>, vector<32x128xf32> -> vector<32x128xf32>
    %96 = arith.addf %92, %95 : vector<32x128xf32>
    %c0_90 = arith.constant 0 : index
    %c2_91 = arith.constant 2 : index
    %c0_92 = arith.constant 0 : index
    %c0_93 = arith.constant 0 : index
    %97 = vector.load %arg2[%c0_90, %c2_91, %c0_92, %c0_93] : memref<3x3x32x32xf32, #tpu.memory_space<vmem>>, vector<1x1x32x32xf32>
    %98 = vector.shape_cast %97 : vector<1x1x32x32xf32> to vector<32x32xf32>
    %cst_94 = arith.constant dense<0.000000e+00> : vector<32x128xf32>
    %99 = tpu.matmul %98, %89, %cst_94 {dimension_numbers = #tpu.dot_dimension_numbers<[1], [0], [0], [1], [0, 0, 1, 1], [], []>} : vector<32x32xf32>, vector<32x128xf32>, vector<32x128xf32> -> vector<32x128xf32>
    %100 = arith.addf %96, %99 : vector<32x128xf32>
    %c0_95 = arith.constant 0 : index
    %c0_96 = arith.constant 0 : index
    %c0_97 = arith.constant 0 : index
    %101 = vector.load %arg3[%c0_95, %c0_96, %c0_97] : memref<3x32x1xf32, #tpu.memory_space<vmem>>, vector<1x32x1xf32>
    %102 = vector.shape_cast %101 : vector<1x32x1xf32> to vector<32x1xf32>
    %103 = vector.broadcast %102 : vector<32x1xf32> to vector<32x128xf32>
    %104 = arith.addf %100, %103 : vector<32x128xf32>
    %cst_98 = arith.constant 0.000000e+00 : f32
    %105 = vector.broadcast %cst_98 : f32 to vector<32x128xf32>
    %106 = arith.maximumf %104, %105 : vector<32x128xf32>
    %c1_i32_99 = arith.constant 1 : i32
    %107 = tpu.dynamic_rotate %106 by %c1_i32_99 dim 1 : vector<32x128xf32>, i32 -> vector<32x128xf32>
    %cst_100 = arith.constant 0.000000e+00 : f32
    %108 = vector.broadcast %cst_100 : f32 to vector<32x128xf32>
    %109 = arith.select %2, %108, %107 : vector<32x128xi1>, vector<32x128xf32>
    %c127_i32_101 = arith.constant 127 : i32
    %110 = tpu.dynamic_rotate %106 by %c127_i32_101 dim 1 : vector<32x128xf32>, i32 -> vector<32x128xf32>
    %cst_102 = arith.constant 0.000000e+00 : f32
    %111 = vector.broadcast %cst_102 : f32 to vector<32x128xf32>
    %112 = arith.select %4, %111, %110 : vector<32x128xi1>, vector<32x128xf32>
    %c1_103 = arith.constant 1 : index
    %c0_104 = arith.constant 0 : index
    %c0_105 = arith.constant 0 : index
    %c0_106 = arith.constant 0 : index
    %113 = vector.load %arg2[%c1_103, %c0_104, %c0_105, %c0_106] : memref<3x3x32x32xf32, #tpu.memory_space<vmem>>, vector<1x1x32x32xf32>
    %114 = vector.shape_cast %113 : vector<1x1x32x32xf32> to vector<32x32xf32>
    %cst_107 = arith.constant dense<0.000000e+00> : vector<32x128xf32>
    %115 = tpu.matmul %114, %109, %cst_107 {dimension_numbers = #tpu.dot_dimension_numbers<[1], [0], [0], [1], [0, 0, 1, 1], [], []>} : vector<32x32xf32>, vector<32x128xf32>, vector<32x128xf32> -> vector<32x128xf32>
    %c1_108 = arith.constant 1 : index
    %c1_109 = arith.constant 1 : index
    %c0_110 = arith.constant 0 : index
    %c0_111 = arith.constant 0 : index
    %116 = vector.load %arg2[%c1_108, %c1_109, %c0_110, %c0_111] : memref<3x3x32x32xf32, #tpu.memory_space<vmem>>, vector<1x1x32x32xf32>
    %117 = vector.shape_cast %116 : vector<1x1x32x32xf32> to vector<32x32xf32>
    %cst_112 = arith.constant dense<0.000000e+00> : vector<32x128xf32>
    %118 = tpu.matmul %117, %106, %cst_112 {dimension_numbers = #tpu.dot_dimension_numbers<[1], [0], [0], [1], [0, 0, 1, 1], [], []>} : vector<32x32xf32>, vector<32x128xf32>, vector<32x128xf32> -> vector<32x128xf32>
    %119 = arith.addf %115, %118 : vector<32x128xf32>
    %c1_113 = arith.constant 1 : index
    %c2_114 = arith.constant 2 : index
    %c0_115 = arith.constant 0 : index
    %c0_116 = arith.constant 0 : index
    %120 = vector.load %arg2[%c1_113, %c2_114, %c0_115, %c0_116] : memref<3x3x32x32xf32, #tpu.memory_space<vmem>>, vector<1x1x32x32xf32>
    %121 = vector.shape_cast %120 : vector<1x1x32x32xf32> to vector<32x32xf32>
    %cst_117 = arith.constant dense<0.000000e+00> : vector<32x128xf32>
    %122 = tpu.matmul %121, %112, %cst_117 {dimension_numbers = #tpu.dot_dimension_numbers<[1], [0], [0], [1], [0, 0, 1, 1], [], []>} : vector<32x32xf32>, vector<32x128xf32>, vector<32x128xf32> -> vector<32x128xf32>
    %123 = arith.addf %119, %122 : vector<32x128xf32>
    %c1_118 = arith.constant 1 : index
    %c0_119 = arith.constant 0 : index
    %c0_120 = arith.constant 0 : index
    %124 = vector.load %arg3[%c1_118, %c0_119, %c0_120] : memref<3x32x1xf32, #tpu.memory_space<vmem>>, vector<1x32x1xf32>
    %125 = vector.shape_cast %124 : vector<1x32x1xf32> to vector<32x1xf32>
    %126 = vector.broadcast %125 : vector<32x1xf32> to vector<32x128xf32>
    %127 = arith.addf %123, %126 : vector<32x128xf32>
    %cst_121 = arith.constant 0.000000e+00 : f32
    %128 = vector.broadcast %cst_121 : f32 to vector<32x128xf32>
    %129 = arith.maximumf %127, %128 : vector<32x128xf32>
    %c1_i32_122 = arith.constant 1 : i32
    %130 = tpu.dynamic_rotate %129 by %c1_i32_122 dim 1 : vector<32x128xf32>, i32 -> vector<32x128xf32>
    %cst_123 = arith.constant 0.000000e+00 : f32
    %131 = vector.broadcast %cst_123 : f32 to vector<32x128xf32>
    %132 = arith.select %2, %131, %130 : vector<32x128xi1>, vector<32x128xf32>
    %c127_i32_124 = arith.constant 127 : i32
    %133 = tpu.dynamic_rotate %129 by %c127_i32_124 dim 1 : vector<32x128xf32>, i32 -> vector<32x128xf32>
    %cst_125 = arith.constant 0.000000e+00 : f32
    %134 = vector.broadcast %cst_125 : f32 to vector<32x128xf32>
    %135 = arith.select %4, %134, %133 : vector<32x128xi1>, vector<32x128xf32>
    %c2_126 = arith.constant 2 : index
    %c0_127 = arith.constant 0 : index
    %c0_128 = arith.constant 0 : index
    %c0_129 = arith.constant 0 : index
    %136 = vector.load %arg2[%c2_126, %c0_127, %c0_128, %c0_129] : memref<3x3x32x32xf32, #tpu.memory_space<vmem>>, vector<1x1x32x32xf32>
    %137 = vector.shape_cast %136 : vector<1x1x32x32xf32> to vector<32x32xf32>
    %cst_130 = arith.constant dense<0.000000e+00> : vector<32x128xf32>
    %138 = tpu.matmul %137, %132, %cst_130 {dimension_numbers = #tpu.dot_dimension_numbers<[1], [0], [0], [1], [0, 0, 1, 1], [], []>} : vector<32x32xf32>, vector<32x128xf32>, vector<32x128xf32> -> vector<32x128xf32>
    %c2_131 = arith.constant 2 : index
    %c1_132 = arith.constant 1 : index
    %c0_133 = arith.constant 0 : index
    %c0_134 = arith.constant 0 : index
    %139 = vector.load %arg2[%c2_131, %c1_132, %c0_133, %c0_134] : memref<3x3x32x32xf32, #tpu.memory_space<vmem>>, vector<1x1x32x32xf32>
    %140 = vector.shape_cast %139 : vector<1x1x32x32xf32> to vector<32x32xf32>
    %cst_135 = arith.constant dense<0.000000e+00> : vector<32x128xf32>
    %141 = tpu.matmul %140, %129, %cst_135 {dimension_numbers = #tpu.dot_dimension_numbers<[1], [0], [0], [1], [0, 0, 1, 1], [], []>} : vector<32x32xf32>, vector<32x128xf32>, vector<32x128xf32> -> vector<32x128xf32>
    %142 = arith.addf %138, %141 : vector<32x128xf32>
    %c2_136 = arith.constant 2 : index
    %c2_137 = arith.constant 2 : index
    %c0_138 = arith.constant 0 : index
    %c0_139 = arith.constant 0 : index
    %143 = vector.load %arg2[%c2_136, %c2_137, %c0_138, %c0_139] : memref<3x3x32x32xf32, #tpu.memory_space<vmem>>, vector<1x1x32x32xf32>
    %144 = vector.shape_cast %143 : vector<1x1x32x32xf32> to vector<32x32xf32>
    %cst_140 = arith.constant dense<0.000000e+00> : vector<32x128xf32>
    %145 = tpu.matmul %144, %135, %cst_140 {dimension_numbers = #tpu.dot_dimension_numbers<[1], [0], [0], [1], [0, 0, 1, 1], [], []>} : vector<32x32xf32>, vector<32x128xf32>, vector<32x128xf32> -> vector<32x128xf32>
    %146 = arith.addf %142, %145 : vector<32x128xf32>
    %c2_141 = arith.constant 2 : index
    %c0_142 = arith.constant 0 : index
    %c0_143 = arith.constant 0 : index
    %147 = vector.load %arg3[%c2_141, %c0_142, %c0_143] : memref<3x32x1xf32, #tpu.memory_space<vmem>>, vector<1x32x1xf32>
    %148 = vector.shape_cast %147 : vector<1x32x1xf32> to vector<32x1xf32>
    %149 = vector.broadcast %148 : vector<32x1xf32> to vector<32x128xf32>
    %150 = arith.addf %146, %149 : vector<32x128xf32>
    %cst_144 = arith.constant 0.000000e+00 : f32
    %151 = vector.broadcast %cst_144 : f32 to vector<32x128xf32>
    %152 = arith.maximumf %150, %151 : vector<32x128xf32>
    %c1_145 = arith.constant 1 : index
    %c0_146 = arith.constant 0 : index
    %c0_147 = arith.constant 0 : index
    %153 = vector.load %arg1[%c1_145, %c0_146, %c0_147] : memref<2x32x128xf32, #tpu.memory_space<vmem>>, vector<1x32x128xf32>
    %154 = vector.shape_cast %153 : vector<1x32x128xf32> to vector<32x128xf32>
    %155 = arith.addf %152, %154 : vector<32x128xf32>
    %c1_148 = arith.constant 1 : index
    %c0_149 = arith.constant 0 : index
    %c0_150 = arith.constant 0 : index
    %156 = vector.load %arg4[%c1_148, %c0_149, %c0_150] : memref<2x32x128xf32, #tpu.memory_space<vmem>>, vector<1x32x128xf32>
    %157 = vector.shape_cast %156 : vector<1x32x128xf32> to vector<32x128xf32>
    %158 = vector.shape_cast %155 : vector<32x128xf32> to vector<1x32x128xf32>
    tpu.vector_store %arg4[%c1_148, %c0_149, %c0_150], %158 {strides = array<i32>} : memref<2x32x128xf32, #tpu.memory_space<vmem>>, vector<1x32x128xf32>,
    return
  }
  func.func @transform_0(%arg0: i32) -> (i32, i32, i32) {
    %c0_i32 = arith.constant 0 : i32
    %c0_i32_0 = arith.constant 0 : i32
    %c0_i32_1 = arith.constant 0 : i32
    return %arg0, %c0_i32, %c0_i32_0 : i32, i32, i32
  }
  func.func @transform_1(%arg0: i32) -> (i32, i32, i32, i32) {
    %c0_i32 = arith.constant 0 : i32
    %c0_i32_0 = arith.constant 0 : i32
    %c0_i32_1 = arith.constant 0 : i32
    %c0_i32_2 = arith.constant 0 : i32
    %c0_i32_3 = arith.constant 0 : i32
    return %c0_i32, %c0_i32_0, %c0_i32_1, %c0_i32_2 : i32, i32, i32, i32
  }
  func.func @transform_2(%arg0: i32) -> (i32, i32, i32) {
    %c0_i32 = arith.constant 0 : i32
    %c0_i32_0 = arith.constant 0 : i32
    %c0_i32_1 = arith.constant 0 : i32
    %c0_i32_2 = arith.constant 0 : i32
    return %c0_i32, %c0_i32_0, %c0_i32_1 : i32, i32, i32
  }
  func.func @transform_3(%arg0: i32) -> (i32, i32, i32) {
    %c0_i32 = arith.constant 0 : i32
    %c0_i32_0 = arith.constant 0 : i32
    %c0_i32_1 = arith.constant 0 : i32
    return %arg0, %c0_i32, %c0_i32_0 : i32, i32, i32
  }
}

</mosaic_0001>

<bundles_post_ra>
// kernel: tpu_custom_call.1
= control target key start
LH: loop header
LB: loop body
LE: loop exit
PB: predicated region body
PF: predicated region fallthrough
CT: control target
= control target key end

     0   :  { %8 = vsyncpa [#allocation3], 0  ;;  %s4138_s0 = inlined_call_operand.hbm [shape: f32[8,32,128], index: 0, kind: input, shape index: {}]   ;;  %s4139_s1 = inlined_call_operand.hbm [shape: f32[3,3,32,32], index: 1, kind: input, shape index: {}]   ;;  %s4140_s2 = inlined_call_operand.vmem [shape: f32[3,32,1], index: 2, kind: input, shape index: {}]   ;;  %s4141_s3 = inlined_call_operand.hbm [shape: f32[8,32,128], index: 3, kind: output, shape index: {}]  }
   0x1   :  { %10 = vsyncpa [#allocation3 + $0x1], 0 }
   0x2   :  { %11 = vsyncpa [#allocation6], 0 }
   0x3   :  { %12 = vsyncpa [#allocation4], 0 }
   0x4   :  { %14 = vsyncpa [#allocation4 + $0x1], 0  ;;  %s3360_s12 = smov 0   ;;  %s3362_s13 = smov 0  }
   0x5   :  { %s3364_s14 = smov 0   ;;  %s3366_s15 = smov 0  }
   0x6 LB: > { %s3381_s16 = sadd.s32 4294967295, %s3328_s15   ;;  %s2524_s17 = sadd.s32 4294967294, %s3328_s15   ;;  %s3328_s15 = sphi %s3366_s15, %s4162_s15   ;;  %s3324_s14 = sphi %s3364_s14, %s4161_s14   ;;  %s3320_s13 = sphi %s3362_s13, %s4160_s13   ;;  %s3316_s12 = sphi %s3360_s12, %s4159_s12  }
   0x7   : > { %p40_p0 = scmp.ne.s32.totalorder %s3320_s13, %s3316_s12  ;;  %p4142_p1 = scmp.eq.s32.totalorder %s3381_s16, 0 }
   0x8   : > { %p112_p3 = scmp.eq.s32.totalorder %s2524_s17, 3  ;;  %p2525_p5 = scmp.ge.s32.totalorder %s3328_s15, 1 }
   0x9   : > { %p3390_p4 = por %p4142_p1, %p40_p0  ;;  %p119_p7 = scmp.lt.s32.totalorder %s3328_s15, 5 }
   0xa   : > { %p3395_p6 = por %p112_p3, %p40_p0  ;;  %s3330_s21 = smov [#allocation5]  }
   0xb   : > { %s4146_s18 = scalar_select %p3390_p4, 1, 0 }
   0xc   : > { %s4147_s19 = scalar_select %p3395_p6, 1, 0 }
   0xd   : > { %p3400_p8 = pnand %p2525_p5, %p119_p7  ;;  %s131_s22 = sshll.u32 %s3330_s21, 4  ;;  %s132_s22 = int_to_ptr.vmem [resolvable:$true] %s131_s22 }
   0xe   : > { %s3413_s24 = sadd.s32 1, %s3328_s15   ;;  %s27_s25 = sadd.s32 1, %s3324_s14 }
   0xf   : > { %s4148_s20 = scalar_select %p3400_p8, 1, 0 }
  0x10   : > { %p3144_p9 = pneg %p3400_p8  ;;  %s24_s26 = ssub.s32 %s3328_s15, %s3413_s24 }
  0x11   : > { %s3217_s27 = scalar_lea.vmem %s132_s22, 4608  ;;  %p3225_p3 = scmp.lt.s32.totalorder %s132_s22, %s132_s22 }
  0x12   : > { %p3408_p10 = pnand %p3144_p9, %p4142_p1  ;;  %p3218_p12 = scmp.ne.s32.totalorder %s132_s22, %s3217_s27 }
  0x13   : > { %p3226_p5 = scmp.lt.s32.totalorder %s3217_s27, %s3217_s27 }
  0x14   : > { %p3208_p11 = pneg %p3408_p10 }
  0x15   : > { %p3227_p7 = por %p3226_p5, %p3225_p3 }
  0x16   : > { %p3220_p13 = pnand %p3218_p12, %p3208_p11 }
  0x18   : > { %p3221_p0 = pneg %p3220_p13 }
  0x1a   : > { %p3228_p2 = pnand %p3227_p7, %p3221_p0 }
  0x1c   : > { %3231 = shalt.err (!%p3228_p2)
}
  0x1d   : > { %s3331_s28 = smov 128   ;;  %s3332_s29 = smov 8  }
  0x1e   : > { %3147 = dma.hbm_to_vmem [thread:$0]  (!%p3408_p10), %s4139_s1, 4608, %s132_s22, [#allocation6], %s3331_s28, %s3331_s28, %s3332_s29  }
  0x1f   : > { %p25_p2 = scmp.eq.s32.totalorder %s24_s26, 0  ;;  %p34_p9 = scmp.ne.s32.totalorder %s3324_s14, %s3320_s13 }
  0x20   : > { %p35_p11 = scmp.eq.s32.totalorder %s3328_s15, 0  ;;  %p3157_p12 = scmp.lt.s32.totalorder %s3328_s15, 4 }
  0x21   : > { %s3433_s5 = scalar_select %p25_p2, %s3324_s14, %s27_s25  }
  0x22   : > { %p36_p13 = por %p35_p11, %p34_p9  ;;  %p4150_p0 = scmp.eq.s32.totalorder %s3381_s16, 3 }
  0x23   : > { %s148_s7 = sand.u32 1, %s3324_s14   ;;  %s2735_s8 = sshll.u32 %s3328_s15, 10 }
  0x24   : > { %p3437_p3 = por %p4150_p0, %p34_p9  ;;  %s2528_s9 = sshll.u32 %s148_s7, 6 }
  0x25   : > { %s3446_s17 = scalar_lea.hbm %s4138_s0, %s2735_s8  ;;  %s152_s21 = scalar_lea.vmem [#allocation2], %s2528_s9 }
  0x26   : > { %s4151_s6 = scalar_select %p3437_p3, 1, 0 }
  0x27   : > { %s160_s22 = sshll.u32 %s152_s21, 4  ;;  %p3448_p10 = pnand %p3157_p12, %p36_p13  ;;  %s3452_s22 = int_to_ptr.vmem [resolvable:$true] %s160_s22 }
  0x28   : > { %s3454_s25 = scalar_lea.sflag [#allocation3], %s148_s7  ;;  %s3232_s26 = scalar_lea.hbm %s3446_s17, 1024 }
  0x29   : > { %p3233_p5 = scmp.ne.s32.totalorder %s3446_s17, %s3232_s26  ;;  %p3234_p7 = pneg %p3448_p10 }
  0x2a   : > { %s3237_s4 = scalar_lea.hbm %s4138_s0, 4096  ;;  %p3238_p11 = scmp.lt.s32.totalorder %s3446_s17, %s4138_s0 }
  0x2b   : > { %p3235_p2 = pnand %p3234_p7, %p3233_p5  ;;  %p3239_p12 = scmp.lt.s32.totalorder %s3237_s4, %s3232_s26 }
  0x2d   : > { %p3236_p9 = pneg %p3235_p2  ;;  %p3240_p13 = por %p3239_p12, %p3238_p11 }
  0x2f   : > { %p3241_p0 = pnand %p3240_p13, %p3236_p9 }
  0x31   : > { %3244 = shalt.err (!%p3241_p0)
}
  0x32   : > { %s3245_s7 = scalar_lea.vmem %s3452_s22, 1024  ;;  %s3333_s10 = smov [#allocation2]  }
  0x33   : > { %p3246_p1 = scmp.ne.s32.totalorder %s3452_s22, %s3245_s7  ;;  %s3250_s11 = sshll.u32 %s3333_s10, 4  ;;  %s3251_s11 = int_to_ptr.vmem [resolvable:$false] %s3250_s11 }
  0x34   : > { %s3252_s21 = scalar_lea.vmem %s3251_s11, 2048  ;;  %p3253_p2 = scmp.lt.s32.totalorder %s3452_s22, %s3251_s11 }
  0x35   : > { %p3248_p6 = pnand %p3246_p1, %p3234_p7  ;;  %p3254_p3 = scmp.lt.s32.totalorder %s3252_s21, %s3245_s7 }
  0x37   : > { %p3249_p5 = pneg %p3248_p6  ;;  %p3255_p4 = por %p3254_p3, %p3253_p2 }
  0x39   : > { %p3256_p8 = pnand %p3255_p4, %p3249_p5 }
  0x3b   : > { %3259 = shalt.err (!%p3256_p8)
}
  0x3c   : > { %3151 = dma.hbm_to_vmem [thread:$0]  (!%p3448_p10), %s3446_s17, 1024, %s3452_s22, %s3454_s25, %s3331_s28, %s3331_s28, %s3332_s29  }
  0x3d   : > { %p4153_p1 = scmp.ne.s32.totalorder %s4148_s20, 0 }
  0x3e   : > { %s3481_s26 = sand.u32 (!%p4153_p1), 1, %s3320_s13   ;;  %p4154_p4 = scmp.ne.s32.totalorder (!%p4153_p1), %s4146_s18, 0 }
  0x3f   : > { %172 = sbr.rel (%p4153_p1) target bundleno = 1779 (0x6f3), region = 32  ;;  %s2533_s27 = sshll.u32 (!%p4153_p1), %s3481_s26, 6 }
  0x40   : > { %s175_s30 = scalar_lea.sflag (!%p4153_p1), [#allocation3], %s3481_s26  ;;  %s3487_s23 = scalar_lea.vmem (!%p4153_p1), [#allocation2], %s2533_s27 }
  0x44   : > { %3303 = dma.done.wait (%p4154_p4), %s175_s30, 1024  }
  0x45   : > { %3305 = vsyncadd (%p4154_p4), %s175_s30, 4294966272  ;;  %p4155_p6 = scmp.eq.s32.totalorder %s3381_s16, 0 }
  0x47   : > { %3307 = dma.done.wait (%p4155_p6), [#allocation6], 4608   ;;  %p4156_p8 = pmov %p4155_p6 }
  0x48   : > { %vm248_vm0 = vcmask 261120   ;;  %v214_v0 = vld [vmem:[%s3487_s23 + $0x18] sm:$0xff]  ;;  %s3334_s20 = smov 127   ;;  %s3335_s28 = smov 1   ;;  %v3500_v1 = vld [vmem:[#allocation5 + $0x20] sm:$0xff]  ;;  %v213_v2 = vld [vmem:[%s3487_s23 + $0x10] sm:$0xff]  ;;  %v207_v15 = vlaneseq }
  0x49   : > { %3309 = vsyncadd (%p4156_p8), [#allocation6], 4294962688  ;;  %233 = vrot.lane.b32.xlu1 %v214_v0, %s3334_s20  ;;  %221 = vrot.lane.b32.xlu0 %v214_v0, %s3335_s28  ;;  %v212_v3 = vld [vmem:[%s3487_s23 + $0x8] sm:$0xff]  ;;  %v3506_v4 = vld [vmem:[#allocation5] sm:$0xff]  ;;  %v3336_v7 = vmov 0   ;;  %s2427_s18 = scalar_lea.sflag [#allocation4], %s3481_s26 }
  0x4a   : > { %2884 = vmatprep.subr.mxu0 %v214_v0  ;;  %2892 = vmatprep.mubr.msk.f32.mxu0 %vm248_vm0, %v3500_v1  ;;  %v211_v5 = vld [vmem:[%s3487_s23] sm:$0xff]  ;;  %v3515_v6 = vld [vmem:[#allocation5 + $0x28] sm:$0xff]  ;;  %v3517_v8 = vld [vmem:[#allocation5 + $0x30] sm:$0xff]  ;;  %v3557_v16 = vand.u32 127, %v207_v15  ;;  %p4157_p10 = scmp.ne.s32.totalorder %s4151_s6, 0  ;;  %s3337_s29 = smov [#allocation7]  }
  0x4b   : > { %2885 = vmatpush3.msra.mxu0 %v214_v0  ;;  %2906 = vmatprep.mubr.msk.f32.mxu1 %vm248_vm0, %v3506_v4  ;;  %v3523_v9 = vld [vmem:[#allocation5 + $0x38] sm:$0xff]  ;;  %v3527_v10 = vld [vmem:[#allocation5 + $0x40] sm:$0xff]  ;;  %v3532_v11 = vld [vmem:[%s4140_s2 + $0x10] sm:$0xff]  ;;  %s3264_s17 = sshll.u32 %s3337_s29, 4  ;;  %s3265_s17 = int_to_ptr.vmem [resolvable:$false] %s3264_s17 }
  0x4c   : > { %2886 = vmatprep.subr.mxu0 %v213_v2  ;;  %3201 = vset.pattern.permute.xlu1 %v3336_v7  ;;  %v3537_v12 = vld [vmem:[%s4140_s2 + $0x18] sm:$0xff]  ;;  %v3548_v13 = vld [vmem:[%s4140_s2 + $0x8] sm:$0xff]  ;;  %v3553_v14 = vld [vmem:[%s4140_s2] sm:$0xff]  ;;  %vm2738_vm1 = vcmp.ne.s32.totalorder %v3557_v16, 0  ;;  %vm2739_vm2 = vcmp.ne.s32.totalorder %v3557_v16, 127  ;;  %s3266_s22 = scalar_lea.vmem %s3265_s17, 2048 }
  0x4d   : > { %219 = vrot.lane.b32.xlu0 %v213_v2, %s3335_s28  ;;  %217 = vrot.lane.b32.xlu1 %v212_v3, %s3335_s28  ;;  %v3577_v23 = vld [vmem:[#allocation5 + $0x8] sm:$0xff]  ;;  %v3583_v24 = vld [vmem:[#allocation5 + $0x10] sm:$0xff]  ;;  %v3593_v27 = vld [vmem:[#allocation5 + $0x18] sm:$0xff] }
  0x4e   : > { %2887 = vmatpush3.msra.mxu0 %v213_v2  ;;  %3200 = vset.pattern.permute.xlu0 %v3336_v7  ;;  %v3599_v28 = vld [vmem:[#allocation5 + $0x48] sm:$0xff]  ;;  %v3605_v29 = vld [vmem:[#allocation5 + $0x50] sm:$0xff]  ;;  %v3613_v30 = vld [vmem:[#allocation5 + $0x58] sm:$0xff] }
  0x4f   : > { %2888 = vmatprep.subr.mxu0 %v212_v3  ;;  %v3617_v44 = vld [vmem:[#allocation5 + $0x80] sm:$0xff]  ;;  %v3647_v15 = vld [vmem:[%s4140_s2 + $0x30] sm:$0xff] }
  0x50   : > { %2889 = vmatpush3.msra.mxu0 %v212_v3  ;;  %v3621_v50 = vld [vmem:[#allocation5 + $0x60] sm:$0xff] }
  0x51   : > { %231 = vrot.lane.b32.xlu0 %v213_v2, %s3334_s20  ;;  %215 = vrot.lane.b32.xlu1 %v211_v5, %s3335_s28  ;;  %v3629_v2 = vld [vmem:[#allocation5 + $0x88] sm:$0xff]  ;;  %v3642_v7 = vld [vmem:[#allocation5 + $0xa0] sm:$0xff] }
  0x52   : > { %2890 = vmatprep.subr.mxu0 %v211_v5 }
  0x53   : > { %2891 = vmatpush3.msra.mxu0 %v211_v5 }
  0x54   : > { %2893 = vmatmul.mubr.msk.f32.vlgmr.msra.gmra.mxu0 %vm248_vm0, %v3515_v6 }
  0x55   : > { %229 = vrot.lane.b32.xlu0 %v212_v3, %s3334_s20  ;;  %227 = vrot.lane.b32.xlu1 %v211_v5, %s3334_s20  ;;  %v3632_v3 = vld [vmem:[#allocation5 + $0x90] sm:$0xff]  ;;  %v3639_v5 = vld [vmem:[#allocation5 + $0x98] sm:$0xff] }
  0x56   : > { %2895 = vmatprep.mubr.msk.f32.mxu0 %vm248_vm0, %v3517_v8 }
  0x58   : > { %2896 = vmatmul.mubr.msk.f32.gmra.mxu0 %vm248_vm0, %v3523_v9 }
  0x59   : > { %2920 = vmatprep.mubr.msk.f32.mxu0 %vm248_vm0, %v3527_v10  ;;  %565 = vperm.xlu1 %3201, %v3532_v11  }
  0x5a   : > { %570 = vperm.xlu0 %3200, %v3537_v12  }
  0x5d   : > { %560 = vperm.xlu1 %3201, %v3548_v13  }
  0x5e   : > { %555 = vperm.xlu0 %3200, %v3553_v14  }
  0xbb   : > { %v234_v17 = vpop.permute.xlu1 %233  ;;  %v222_v18 = vpop.permute.xlu0 %221 }
  0xbc   : > { %2898 = vmatprep.subr.msk.mxu1 %vm2738_vm1, %v222_v18  ;;  %2912 = vmatprep.subr.msk.mxu0 %vm2739_vm2, %v234_v17 }
  0xbd   : > { %2899 = vmatpush3.msk.msra.mxu1 %vm2738_vm1, %v222_v18  ;;  %2913 = vmatpush3.msk.msra.mxu0 %vm2739_vm2, %v234_v17  ;;  %v3655_v17 = vld [vmem:[%s4140_s2 + $0x38] sm:$0xff]  ;;  %v3663_v18 = vld [vmem:[%s4140_s2 + $0x20] sm:$0xff] }
  0xbf   : > { %v220_v19 = vpop.permute.xlu0 %219  ;;  %v218_v20 = vpop.permute.xlu1 %217 }
  0xc0   : > { %2900 = vmatprep.subr.msk.mxu1 %vm2738_vm1, %v220_v19 }
  0xc1   : > { %2901 = vmatpush3.msk.msra.mxu1 %vm2738_vm1, %v220_v19  ;;  %v3669_v19 = vld [vmem:[%s4140_s2 + $0x28] sm:$0xff] }
  0xc2   : > { %2902 = vmatprep.subr.msk.mxu1 %vm2738_vm1, %v218_v20 }
  0xc3   : > { %v232_v21 = vpop.permute.xlu0 %231  ;;  %2903 = vmatpush3.msk.msra.mxu1 %vm2738_vm1, %v218_v20  ;;  %v216_v22 = vpop.permute.xlu1 %215 }
  0xc4   : > { %2904 = vmatprep.subr.msk.mxu1 %vm2738_vm1, %v216_v22  ;;  %2914 = vmatprep.subr.msk.mxu0 %vm2739_vm2, %v232_v21 }
  0xc5   : > { %2905 = vmatpush3.msk.msra.mxu1 %vm2738_vm1, %v216_v22  ;;  %2915 = vmatpush3.msk.msra.mxu0 %vm2739_vm2, %v232_v21 }
  0xc6   : > { %2907 = vmatmul.mubr.msk.f32.vlgmr.msra.gmra.mxu1 %vm248_vm0, %v3577_v23 }
  0xc7   : > { %v230_v25 = vpop.permute.xlu0 %229  ;;  %2909 = vmatprep.mubr.msk.f32.mxu1 %vm248_vm0, %v3583_v24  ;;  %v228_v26 = vpop.permute.xlu1 %227 }
  0xc8   : > { %2916 = vmatprep.subr.msk.mxu0 %vm2739_vm2, %v230_v25 }
  0xc9   : > { %2917 = vmatpush3.msk.msra.mxu0 %vm2739_vm2, %v230_v25 }
  0xca   : > { %2910 = vmatmul.mubr.msk.f32.gmra.mxu1 %vm248_vm0, %v3593_v27  ;;  %2918 = vmatprep.subr.msk.mxu0 %vm2739_vm2, %v228_v26 }
  0xcb   : > { %2919 = vmatpush3.msk.msra.mxu0 %vm2739_vm2, %v228_v26  ;;  %2934 = vmatprep.mubr.msk.f32.mxu1 %vm248_vm0, %v3617_v44 }
  0xcc   : > { %2921 = vmatmul.mubr.msk.f32.vlgmr.msra.gmra.mxu0 %vm248_vm0, %v3599_v28 }
  0xcd   : > { %2923 = vmatprep.mubr.msk.f32.mxu0 %vm248_vm0, %v3605_v29 }
  0xd0   : > { %2924 = vmatmul.mubr.msk.f32.gmra.mxu0 %vm248_vm0, %v3613_v30 }
  0xd1   : > { %2948 = vmatprep.mubr.msk.f32.mxu0 %vm248_vm0, %v3621_v50 }
  0xd4   : > { %v566_v33 = vpop.permute.xlu1 %565 }
  0xd5   : > { %v571_v42 = vpop.permute.xlu0 %570 }
  0xd8   : > { %v561_v41 = vpop.permute.xlu1 %560 }
  0xd9   : > { %v556_v59 = vpop.permute.xlu0 %555 }
 0x114   : > { %v2894_v31 = vpop.f32.mrf.mxu0 }
 0x116   : > { %v327_v32 = vpop.f32.mrf.mxu0 }
 0x118   : > { %v2897_v34 = vpop.f32.mrf.mxu0 }
 0x11a   : > { %v337_v37 = vpop.f32.mrf.mxu0 }
 0x186   : > { %v2908_v35 = vpop.f32.mrf.mxu1 }
 0x187   : > { %v430_v39 = vadd.f32 %v2908_v35, %v2894_v31  ;;  %v3689_v31 = vld [vmem:[#allocation5 + $0x68] sm:$0xff] }
 0x188   : > { %v424_v36 = vpop.f32.mrf.mxu1 }
 0x189   : > { %v425_v51 = vadd.f32 %v424_v36, %v327_v32  ;;  %v3693_v32 = vld [vmem:[#allocation5 + $0x70] sm:$0xff] }
 0x18a   : > { %v2911_v38 = vpop.f32.mrf.mxu1 }
 0x18b   : > { %v440_v47 = vadd.f32 %v2911_v38, %v2897_v34  ;;  %v3705_v34 = vld [vmem:[#allocation5 + $0x78] sm:$0xff]  ;;  %v3717_v38 = vld [vmem:[#allocation5 + $0xb0] sm:$0xff] }
 0x18c   : > { %v2922_v40 = vpop.f32.mrf.mxu0  ;;  %v434_v45 = vpop.f32.mrf.mxu1 }
 0x18d   : > { %v546_v43 = vadd.f32 %v2922_v40, %v430_v39  ;;  %v435_v52 = vadd.f32 %v434_v45, %v337_v37  ;;  %v3713_v37 = vld [vmem:[#allocation5 + $0xa8] sm:$0xff]  ;;  %v3725_v39 = vld [vmem:[#allocation5 + $0xb8] sm:$0xff] }
 0x18e   : > { %v526_v46 = vpop.f32.mrf.mxu0 }
 0x18f   : > { %v574_v48 = vadd.f32 %v561_v41, %v546_v43  ;;  %v545_v56 = vadd.f32 %v526_v46, %v425_v51 }
 0x190   : > { %v2925_v49 = vpop.f32.mrf.mxu0 }
 0x191   : > { %v578_v53 = vmax.f32 %v574_v48, 0.0  ;;  %v548_v54 = vadd.f32 %v2925_v49, %v440_v47  ;;  %v573_v62 = vadd.f32 %v556_v59, %v545_v56 }
 0x192   : > { %v536_v55 = vpop.f32.mrf.mxu0 }
 0x193   : > { %v576_v57 = vadd.f32 %v571_v42, %v548_v54  ;;  %v547_v58 = vadd.f32 %v536_v55, %v435_v52  ;;  %583 = vrot.lane.b32.xlu0 %v578_v53, %s3335_s28  ;;  %v577_v0 = vmax.f32 %v573_v62, 0.0 }
 0x195   : > { %v580_v60 = vmax.f32 %v576_v57, 0.0  ;;  %v575_v61 = vadd.f32 %v566_v33, %v547_v58 }
 0x197   : > { %v579_v63 = vmax.f32 %v575_v61, 0.0  ;;  %587 = vrot.lane.b32.xlu1 %v580_v60, %s3335_s28  ;;  %2926 = vmatprep.subr.mxu1 %v580_v60 }
 0x198   : > { %2927 = vmatpush3.msra.mxu1 %v580_v60 }
 0x199   : > { %585 = vrot.lane.b32.xlu0 %v579_v63, %s3335_s28  ;;  %2928 = vmatprep.subr.mxu1 %v579_v63 }
 0x19a   : > { %2929 = vmatpush3.msra.mxu1 %v579_v63 }
 0x19b   : > { %599 = vrot.lane.b32.xlu1 %v580_v60, %s3334_s20  ;;  %2930 = vmatprep.subr.mxu1 %v578_v53 }
 0x19c   : > { %2931 = vmatpush3.msra.mxu1 %v578_v53 }
 0x19d   : > { %581 = vrot.lane.b32.xlu0 %v577_v0, %s3335_s28  ;;  %2932 = vmatprep.subr.mxu1 %v577_v0 }
 0x19e   : > { %2933 = vmatpush3.msra.mxu1 %v577_v0 }
 0x19f   : > { %597 = vrot.lane.b32.xlu1 %v579_v63, %s3334_s20  ;;  %2935 = vmatmul.mubr.msk.f32.vlgmr.msra.gmra.mxu1 %vm248_vm0, %v3629_v2  ;;  %v3729_v63 = vld [vmem:[#allocation5 + $0xe0] sm:$0xff] }
 0x1a0   : > { %2937 = vmatprep.mubr.msk.f32.mxu1 %vm248_vm0, %v3632_v3 }
 0x1a1   : > { %593 = vrot.lane.b32.xlu0 %v577_v0, %s3334_s20 }
 0x1a3   : > { %595 = vrot.lane.b32.xlu1 %v578_v53, %s3334_s20  ;;  %2938 = vmatmul.mubr.msk.f32.gmra.mxu1 %vm248_vm0, %v3639_v5 }
 0x1a4   : > { %2962 = vmatprep.mubr.msk.f32.mxu1 %vm248_vm0, %v3642_v7 }
 0x1a5   : > { %932 = vperm.xlu0 %3200, %v3647_v15  }
 0x1a7   : > { %937 = vperm.xlu1 %3201, %v3655_v17  }
 0x1a9   : > { %922 = vperm.xlu0 %3200, %v3663_v18  }
 0x1ab   : > { %927 = vperm.xlu1 %3201, %v3669_v19  }
 0x205   : > { %v584_v20 = vpop.permute.xlu0 %583 }
 0x209   : > { %v588_v21 = vpop.permute.xlu1 %587 }
 0x20a   : > { %2940 = vmatprep.subr.msk.mxu0 %vm2738_vm1, %v588_v21 }
 0x20b   : > { %2941 = vmatpush3.msk.msra.mxu0 %vm2738_vm1, %v588_v21  ;;  %v586_v22 = vpop.permute.xlu0 %585 }
 0x20c   : > { %2942 = vmatprep.subr.msk.mxu0 %vm2738_vm1, %v586_v22 }
 0x20d   : > { %v600_v25 = vpop.permute.xlu1 %599  ;;  %2943 = vmatpush3.msk.msra.mxu0 %vm2738_vm1, %v586_v22 }
 0x20e   : > { %2944 = vmatprep.subr.msk.mxu0 %vm2738_vm1, %v584_v20  ;;  %2954 = vmatprep.subr.msk.mxu1 %vm2739_vm2, %v600_v25 }
 0x20f   : > { %2945 = vmatpush3.msk.msra.mxu0 %vm2738_vm1, %v584_v20  ;;  %v582_v26 = vpop.permute.xlu0 %581  ;;  %2955 = vmatpush3.msk.msra.mxu1 %vm2739_vm2, %v600_v25 }
 0x210   : > { %2946 = vmatprep.subr.msk.mxu0 %vm2738_vm1, %v582_v26 }
 0x211   : > { %v598_v33 = vpop.permute.xlu1 %597  ;;  %2947 = vmatpush3.msk.msra.mxu0 %vm2738_vm1, %v582_v26 }
 0x212   : > { %2949 = vmatmul.mubr.msk.f32.vlgmr.msra.gmra.mxu0 %vm248_vm0, %v3689_v31  ;;  %2956 = vmatprep.subr.msk.mxu1 %vm2739_vm2, %v598_v33 }
 0x213   : > { %2957 = vmatpush3.msk.msra.mxu1 %vm2739_vm2, %v598_v33  ;;  %2951 = vmatprep.mubr.msk.f32.mxu0 %vm248_vm0, %v3693_v32  ;;  %v594_v36 = vpop.permute.xlu0 %593 }
 0x215   : > { %v596_v35 = vpop.permute.xlu1 %595 }
 0x216   : > { %2952 = vmatmul.mubr.msk.f32.gmra.mxu0 %vm248_vm0, %v3705_v34  ;;  %2958 = vmatprep.subr.msk.mxu1 %vm2739_vm2, %v596_v35 }
 0x217   : > { %2959 = vmatpush3.msk.msra.mxu1 %vm2739_vm2, %v596_v35  ;;  %2976 = vmatprep.mubr.msk.f32.mxu0 %vm248_vm0, %v3729_v63 }
 0x218   : > { %2960 = vmatprep.subr.msk.mxu1 %vm2739_vm2, %v594_v36 }
 0x219   : > { %2961 = vmatpush3.msk.msra.mxu1 %vm2739_vm2, %v594_v36  ;;  %v3734_v36 = vld [vmem:[#allocation5 + $0xc0] sm:$0xff] }
 0x21a   : > { %2963 = vmatmul.mubr.msk.f32.vlgmr.msra.gmra.mxu1 %vm248_vm0, %v3713_v37 }
 0x21b   : > { %2965 = vmatprep.mubr.msk.f32.mxu1 %vm248_vm0, %v3717_v38 }
 0x21e   : > { %2966 = vmatmul.mubr.msk.f32.gmra.mxu1 %vm248_vm0, %v3725_v39 }
 0x21f   : > { %2990 = vmatprep.mubr.msk.f32.mxu1 %vm248_vm0, %v3734_v36 }
 0x220   : > { %v933_v47 = vpop.permute.xlu0 %932 }
 0x222   : > { %v938_v46 = vpop.permute.xlu1 %937 }
 0x224   : > { %v923_v61 = vpop.permute.xlu0 %922 }
 0x226   : > { %v928_v53 = vpop.permute.xlu1 %927 }
 0x25f   : > { %v2936_v40 = vpop.f32.mrf.mxu1 }
 0x261   : > { %v693_v41 = vpop.f32.mrf.mxu1 }
 0x263   : > { %v2939_v43 = vpop.f32.mrf.mxu1 }
 0x265   : > { %v703_v48 = vpop.f32.mrf.mxu1 }
 0x2d2   : > { %v2950_v42 = vpop.f32.mrf.mxu0 }
 0x2d3   : > { %v796_v51 = vadd.f32 %v2950_v42, %v2936_v40 }
 0x2d4   : > { %v790_v45 = vpop.f32.mrf.mxu0 }
 0x2d5   : > { %v791_v54 = vadd.f32 %v790_v45, %v693_v41  ;;  %v3745_v45 = vld [vmem:[#allocation5 + $0xf0] sm:$0xff] }
 0x2d6   : > { %v2953_v49 = vpop.f32.mrf.mxu0 }
 0x2d7   : > { %v806_v58 = vadd.f32 %v2953_v49, %v2939_v43  ;;  %v3742_v43 = vld [vmem:[#allocation5 + $0xe8] sm:$0xff]  ;;  %v3761_v49 = vld [vmem:[%s3487_s23 + $0x30] sm:$0xff] }
 0x2d8   : > { %v800_v56 = vpop.f32.mrf.mxu0 }
 0x2d9   : > { %v801_v0 = vadd.f32 %v800_v56, %v703_v48  ;;  %v3758_v48 = vld [vmem:[#allocation5 + $0x100] sm:$0xff] }
 0x2da   : > { %v2964_v52 = vpop.f32.mrf.mxu1 }
 0x2db   : > { %v912_v55 = vadd.f32 %v2964_v52, %v796_v51  ;;  %v3772_v51 = vld [vmem:[%s3487_s23 + $0x28] sm:$0xff]  ;;  %v3779_v52 = vld [vmem:[%s3487_s23 + $0x20] sm:$0xff] }
 0x2dc   : > { %v892_v57 = vpop.f32.mrf.mxu1 }
 0x2dd   : > { %v941_v59 = vadd.f32 %v928_v53, %v912_v55  ;;  %v911_v60 = vadd.f32 %v892_v57, %v791_v54 }
 0x2de   : > { %v2967_v62 = vpop.f32.mrf.mxu1 }
 0x2df   : > { %v945_v20 = vmax.f32 %v941_v59, 0.0  ;;  %v940_v21 = vadd.f32 %v923_v61, %v911_v60  ;;  %v914_v22 = vadd.f32 %v2967_v62, %v806_v58  ;;  %v3823_v59 = vld [vmem:[#allocation5 + $0xd0] sm:$0xff]  ;;  %v3831_v61 = vld [vmem:[#allocation5 + $0xd8] sm:$0xff]  ;;  %v3833_v62 = vld [vmem:[#allocation5 + $0x108] sm:$0xff] }
 0x2e0   : > { %v902_v25 = vpop.f32.mrf.mxu1 }
 0x2e1   : > { %v944_v26 = vmax.f32 %v940_v21, 0.0  ;;  %v943_v33 = vadd.f32 %v938_v46, %v914_v22  ;;  %v913_v35 = vadd.f32 %v902_v25, %v801_v0  ;;  %950 = vrot.lane.b32.xlu1 %v945_v20, %s3335_s28  ;;  %v3751_v46 = vld [vmem:[%s3487_s23 + $0x38] sm:$0xff]  ;;  %v3848_v21 = vld [vmem:[#allocation5 + $0x110] sm:$0xff] }
 0x2e2   : > { %v3856_v22 = vld [vmem:[#allocation5 + $0x118] sm:$0xff] }
 0x2e3   : > { %v947_v40 = vmax.f32 %v943_v33, 0.0  ;;  %v942_v41 = vadd.f32 %v933_v47, %v913_v35  ;;  %948 = vrot.lane.b32.xlu0 %v944_v26, %s3335_s28  ;;  %v3755_v47 = vld [vmem:[#allocation5 + $0xf8] sm:$0xff] }
 0x2e5   : > { %v946_v42 = vmax.f32 %v942_v41, 0.0  ;;  %962 = vrot.lane.b32.xlu1 %v945_v20, %s3334_s20  ;;  %2968 = vmatprep.subr.mxu0 %v947_v40 }
 0x2e6   : > { %2969 = vmatpush3.msra.mxu0 %v947_v40 }
 0x2e7   : > { %960 = vrot.lane.b32.xlu0 %v944_v26, %s3334_s20  ;;  %2970 = vmatprep.subr.mxu0 %v946_v42 }
 0x2e8   : > { %2971 = vmatpush3.msra.mxu0 %v946_v42 }
 0x2e9   : > { %954 = vrot.lane.b32.xlu1 %v947_v40, %s3335_s28  ;;  %2972 = vmatprep.subr.mxu0 %v945_v20 }
 0x2ea   : > { %2973 = vmatpush3.msra.mxu0 %v945_v20 }
 0x2eb   : > { %952 = vrot.lane.b32.xlu0 %v946_v42, %s3335_s28  ;;  %2974 = vmatprep.subr.mxu0 %v944_v26 }
 0x2ec   : > { %2975 = vmatpush3.msra.mxu0 %v944_v26 }
 0x2ed   : > { %966 = vrot.lane.b32.xlu1 %v947_v40, %s3334_s20  ;;  %2977 = vmatmul.mubr.msk.f32.vlgmr.msra.gmra.mxu0 %vm248_vm0, %v3742_v43 }
 0x2ee   : > { %2979 = vmatprep.mubr.msk.f32.mxu0 %vm248_vm0, %v3745_v45 }
 0x2ef   : > { %964 = vrot.lane.b32.xlu0 %v946_v42, %s3334_s20 }
 0x2f1   : > { %1334 = vrot.lane.b32.xlu1 %v3751_v46, %s3335_s28  ;;  %2980 = vmatmul.mubr.msk.f32.gmra.mxu0 %vm248_vm0, %v3755_v47 }
 0x2f2   : > { %3004 = vmatprep.mubr.msk.f32.mxu0 %vm248_vm0, %v3758_v48 }
 0x2f3   : > { %1332 = vrot.lane.b32.xlu0 %v3761_v49, %s3335_s28 }
 0x2f5   : > { %1346 = vrot.lane.b32.xlu1 %v3751_v46, %s3334_s20 }
 0x2f7   : > { %1330 = vrot.lane.b32.xlu0 %v3772_v51, %s3335_s28 }
 0x2f9   : > { %1344 = vrot.lane.b32.xlu1 %v3761_v49, %s3334_s20 }
 0x2fb   : > { %1328 = vrot.lane.b32.xlu0 %v3779_v52, %s3335_s28 }
 0x2fd   : > { %1342 = vrot.lane.b32.xlu1 %v3772_v51, %s3334_s20 }
 0x2ff   : > { %1340 = vrot.lane.b32.xlu0 %v3779_v52, %s3334_s20 }
 0x301   : > { %1680 = vperm.xlu1 %3201, %v3537_v12  }
 0x303   : > { %1675 = vperm.xlu0 %3200, %v3532_v11  }
 0x305   : > { %1670 = vperm.xlu1 %3201, %v3548_v13   ;;  %v3809_v13 = vld [vmem:[#allocation5 + $0xc8] sm:$0xff] }
 0x307   : > { %1665 = vperm.xlu0 %3200, %v3553_v14  }
 0x353   : > { %v951_v53 = vpop.permute.xlu1 %950 }
 0x355   : > { %v949_v54 = vpop.permute.xlu0 %948 }
 0x357   : > { %v963_v55 = vpop.permute.xlu1 %962 }
 0x359   : > { %v961_v56 = vpop.permute.xlu0 %960 }
 0x35b   : > { %v955_v57 = vpop.permute.xlu1 %954 }
 0x35c   : > { %2982 = vmatprep.subr.msk.mxu1 %vm2738_vm1, %v955_v57 }
 0x35d   : > { %2983 = vmatpush3.msk.msra.mxu1 %vm2738_vm1, %v955_v57  ;;  %v953_v58 = vpop.permute.xlu0 %952 }
 0x35e   : > { %2984 = vmatprep.subr.msk.mxu1 %vm2738_vm1, %v953_v58 }
 0x35f   : > { %v967_v11 = vpop.permute.xlu1 %966  ;;  %2985 = vmatpush3.msk.msra.mxu1 %vm2738_vm1, %v953_v58 }
 0x360   : > { %2986 = vmatprep.subr.msk.mxu1 %vm2738_vm1, %v951_v53  ;;  %2996 = vmatprep.subr.msk.mxu0 %vm2739_vm2, %v967_v11 }
 0x361   : > { %2987 = vmatpush3.msk.msra.mxu1 %vm2738_vm1, %v951_v53  ;;  %v965_v12 = vpop.permute.xlu0 %964  ;;  %2997 = vmatpush3.msk.msra.mxu0 %vm2739_vm2, %v967_v11 }
 0x362   : > { %2988 = vmatprep.subr.msk.mxu1 %vm2738_vm1, %v949_v54  ;;  %2998 = vmatprep.subr.msk.mxu0 %vm2739_vm2, %v965_v12 }
 0x363   : > { %v1335_v14 = vpop.permute.xlu1 %1334  ;;  %2989 = vmatpush3.msk.msra.mxu1 %vm2738_vm1, %v949_v54  ;;  %2999 = vmatpush3.msk.msra.mxu0 %vm2739_vm2, %v965_v12 }
 0x364   : > { %2991 = vmatmul.mubr.msk.f32.vlgmr.msra.gmra.mxu1 %vm248_vm0, %v3809_v13  ;;  %3000 = vmatprep.subr.msk.mxu0 %vm2739_vm2, %v963_v55 }
 0x365   : > { %3010 = vmatprep.subr.mxu1 %v3751_v46  ;;  %v1333_v60 = vpop.permute.xlu0 %1332  ;;  %3001 = vmatpush3.msk.msra.mxu0 %vm2739_vm2, %v963_v55 }
 0x366   : > { %3011 = vmatpush3.msra.mxu1 %v3751_v46  ;;  %3002 = vmatprep.subr.msk.mxu0 %vm2739_vm2, %v961_v56 }
 0x367   : > { %3012 = vmatprep.subr.mxu1 %v3761_v49  ;;  %v1347_v0 = vpop.permute.xlu1 %1346  ;;  %2993 = vmatprep.mubr.msk.f32.mxu1 %vm248_vm0, %v3823_v59 }
 0x368   : > { %3003 = vmatpush3.msk.msra.mxu0 %vm2739_vm2, %v961_v56  ;;  %3013 = vmatpush3.msra.mxu1 %v3761_v49 }
 0x369   : > { %2994 = vmatmul.mubr.msk.f32.gmra.mxu1 %vm248_vm0, %v3831_v61  ;;  %3005 = vmatmul.mubr.msk.f32.vlgmr.msra.gmra.mxu0 %vm248_vm0, %v3833_v62  ;;  %v1331_v20 = vpop.permute.xlu0 %1330 }
 0x36a   : > { %3014 = vmatprep.subr.mxu1 %v3772_v51  ;;  %3024 = vmatprep.subr.msk.mxu0 %vm2738_vm1, %v1335_v14 }
 0x36b   : > { %3015 = vmatpush3.msra.mxu1 %v3772_v51  ;;  %3025 = vmatpush3.msk.msra.mxu0 %vm2738_vm1, %v1335_v14  ;;  %v1345_v25 = vpop.permute.xlu1 %1344 }
 0x36c   : > { %3016 = vmatprep.subr.mxu1 %v3779_v52  ;;  %3026 = vmatprep.subr.msk.mxu0 %vm2738_vm1, %v1333_v60 }
 0x36d   : > { %3007 = vmatprep.mubr.msk.f32.mxu0 %vm248_vm0, %v3848_v21  ;;  %3017 = vmatpush3.msra.mxu1 %v3779_v52  ;;  %v1329_v26 = vpop.permute.xlu0 %1328 }
 0x36e   : > { %3018 = vmatprep.mubr.msk.f32.mxu1 %vm248_vm0, %v3500_v1  ;;  %3027 = vmatpush3.msk.msra.mxu0 %vm2738_vm1, %v1333_v60 }
 0x36f   : > { %3008 = vmatmul.mubr.msk.f32.gmra.mxu0 %vm248_vm0, %v3856_v22  ;;  %3019 = vmatmul.mubr.msk.f32.vlgmr.msra.gmra.mxu1 %vm248_vm0, %v3515_v6  ;;  %v1343_v1 = vpop.permute.xlu1 %1342 }
 0x370   : > { %3028 = vmatprep.subr.msk.mxu0 %vm2738_vm1, %v1331_v20  ;;  %3038 = vmatprep.subr.msk.mxu1 %vm2739_vm2, %v1347_v0 }
 0x371   : > { %3039 = vmatpush3.msk.msra.mxu1 %vm2739_vm2, %v1347_v0  ;;  %3029 = vmatpush3.msk.msra.mxu0 %vm2738_vm1, %v1331_v20  ;;  %v1341_v6 = vpop.permute.xlu0 %1340 }
 0x372   : > { %3030 = vmatprep.subr.msk.mxu0 %vm2738_vm1, %v1329_v26  ;;  %3040 = vmatprep.subr.msk.mxu1 %vm2739_vm2, %v1345_v25 }
 0x373   : > { %3021 = vmatprep.mubr.msk.f32.mxu1 %vm248_vm0, %v3517_v8  ;;  %3031 = vmatpush3.msk.msra.mxu0 %vm2738_vm1, %v1329_v26 }
 0x374   : > { %3032 = vmatprep.mubr.msk.f32.mxu0 %vm248_vm0, %v3506_v4  ;;  %3041 = vmatpush3.msk.msra.mxu1 %vm2739_vm2, %v1345_v25 }
 0x375   : > { %3022 = vmatmul.mubr.msk.f32.gmra.mxu1 %vm248_vm0, %v3523_v9  ;;  %3033 = vmatmul.mubr.msk.f32.vlgmr.msra.gmra.mxu0 %vm248_vm0, %v3577_v23 }
 0x376   : > { %3042 = vmatprep.subr.msk.mxu1 %vm2739_vm2, %v1343_v1  ;;  %3035 = vmatprep.mubr.msk.f32.mxu0 %vm248_vm0, %v3583_v24 }
 0x377   : > { %3043 = vmatpush3.msk.msra.mxu1 %vm2739_vm2, %v1343_v1  ;;  %3046 = vmatprep.mubr.msk.f32.mxu1 %vm248_vm0, %v3527_v10 }
 0x378   : > { %3044 = vmatprep.subr.msk.mxu1 %vm2739_vm2, %v1341_v6 }
 0x379   : > { %3045 = vmatpush3.msk.msra.mxu1 %vm2739_vm2, %v1341_v6  ;;  %3036 = vmatmul.mubr.msk.f32.gmra.mxu0 %vm248_vm0, %v3593_v27 }
 0x37a   : > { %3047 = vmatmul.mubr.msk.f32.vlgmr.msra.gmra.mxu1 %vm248_vm0, %v3599_v28  ;;  %3060 = vmatprep.mubr.msk.f32.mxu0 %vm248_vm0, %v3617_v44 }
 0x37b   : > { %3049 = vmatprep.mubr.msk.f32.mxu1 %vm248_vm0, %v3605_v29 }
 0x37c   : > { %v1681_v58 = vpop.permute.xlu1 %1680 }
 0x37e   : > { %3050 = vmatmul.mubr.msk.f32.gmra.mxu1 %vm248_vm0, %v3613_v30 }
 0x37f   : > { %3074 = vmatprep.mubr.msk.f32.mxu1 %vm248_vm0, %v3621_v50 }
 0x380   : > { %v1671_v26 = vpop.permute.xlu1 %1670 }
 0x3ad   : > { %v2978_v4 = vpop.f32.mrf.mxu0 }
 0x3af   : > { %v1060_v8 = vpop.f32.mrf.mxu0 }
 0x3b1   : > { %v2981_v9 = vpop.f32.mrf.mxu0 }
 0x3b3   : > { %v1070_v23 = vpop.f32.mrf.mxu0 }
 0x424   : > { %v2992_v10 = vpop.f32.mrf.mxu1 }
 0x425   : > { %v1163_v27 = vadd.f32 %v2992_v10, %v2978_v4  ;;  %v1676_v10 = vpop.permute.xlu0 %1675 }
 0x426   : > { %v1157_v24 = vpop.f32.mrf.mxu1 }
 0x427   : > { %v1158_v35 = vadd.f32 %v1157_v24, %v1060_v8 }
 0x429   : > { %v2995_v28 = vpop.f32.mrf.mxu1  ;;  %v3006_v33 = vpop.f32.mrf.mxu0 }
 0x42a   : > { %v3917_v44 = vadd.f32 %v3006_v33, %v1163_v27  ;;  %v1173_v30 = vadd.f32 %v2995_v28, %v2981_v9 }
 0x42b   : > { %v1167_v40 = vpop.f32.mrf.mxu1  ;;  %v1259_v29 = vpop.f32.mrf.mxu0 }
 0x42c   : > { %v1168_v41 = vadd.f32 %v1167_v40, %v1070_v23  ;;  %v3919_v42 = vadd.f32 %v1259_v29, %v1158_v35 }
 0x42f   : > { %v3009_v53 = vpop.f32.mrf.mxu0  ;;  %v3020_v50 = vpop.f32.mrf.mxu1 }
 0x430   : > { %v3921_v54 = vadd.f32 %v3009_v53, %v1173_v30 }
 0x431   : > { %v1269_v55 = vpop.f32.mrf.mxu0  ;;  %v1438_v56 = vpop.f32.mrf.mxu1 }
 0x432   : > { %v3923_v57 = vadd.f32 %v1269_v55, %v1168_v41 }
 0x435   : > { %v3023_v11 = vpop.f32.mrf.mxu1  ;;  %v3034_v12 = vpop.f32.mrf.mxu0 }
 0x436   : > { %v1541_v0 = vadd.f32 %v3034_v12, %v3020_v50  ;;  %v1666_v50 = vpop.permute.xlu0 %1665 }
 0x437   : > { %v1448_v14 = vpop.f32.mrf.mxu1  ;;  %v1535_v60 = vpop.f32.mrf.mxu0 }
 0x438   : > { %v1536_v24 = vadd.f32 %v1535_v60, %v1438_v56 }
 0x439   : > { %v3037_v20 = vpop.f32.mrf.mxu0 }
 0x43a   : > { %v3048_v25 = vpop.f32.mrf.mxu1  ;;  %v1551_v8 = vadd.f32 %v3037_v20, %v3023_v11 }
 0x43b   : > { %v1656_v1 = vadd.f32 %v3048_v25, %v1541_v0  ;;  %v1545_v6 = vpop.f32.mrf.mxu0 }
 0x43c   : > { %v1636_v4 = vpop.f32.mrf.mxu1  ;;  %v1546_v28 = vadd.f32 %v1545_v6, %v1448_v14 }
 0x43d   : > { %v1684_v9 = vadd.f32 %v1671_v26, %v1656_v1  ;;  %v1655_v40 = vadd.f32 %v1636_v4, %v1536_v24 }
 0x43e   : > { %v3051_v23 = vpop.f32.mrf.mxu1 }
 0x43f   : > { %v1688_v27 = vmax.f32 %v1684_v9, 0.0  ;;  %v1658_v33 = vadd.f32 %v3051_v23, %v1551_v8  ;;  %v1683_v55 = vadd.f32 %v1666_v50, %v1655_v40  ;;  %v2624_v50 = vld [vmem:[%s4140_s2 + $0x40] sm:$0xff] }
 0x440   : > { %v1646_v35 = vpop.f32.mrf.mxu1 }
 0x441   : > { %v1686_v29 = vadd.f32 %v1681_v58, %v1658_v33  ;;  %v1657_v41 = vadd.f32 %v1646_v35, %v1546_v28  ;;  %1693 = vrot.lane.b32.xlu0 %v1688_v27, %s3335_s28  ;;  %v1687_v56 = vmax.f32 %v1683_v55, 0.0 }
 0x443   : > { %v1690_v30 = vmax.f32 %v1686_v29, 0.0  ;;  %v1685_v53 = vadd.f32 %v1676_v10, %v1657_v41 }
 0x445   : > { %v1689_v12 = vmax.f32 %v1685_v53, 0.0  ;;  %1697 = vrot.lane.b32.xlu1 %v1690_v30, %s3335_s28  ;;  %3052 = vmatprep.subr.mxu0 %v1690_v30  ;;  %v2625_v53 = vld [vmem:[%s4140_s2 + $0x48] sm:$0xff] }
 0x446   : > { %3053 = vmatpush3.msra.mxu0 %v1690_v30 }
 0x447   : > { %1695 = vrot.lane.b32.xlu0 %v1689_v12, %s3335_s28  ;;  %3054 = vmatprep.subr.mxu0 %v1689_v12 }
 0x448   : > { %3055 = vmatpush3.msra.mxu0 %v1689_v12 }
 0x449   : > { %1709 = vrot.lane.b32.xlu1 %v1690_v30, %s3334_s20  ;;  %3056 = vmatprep.subr.mxu0 %v1688_v27 }
 0x44a   : > { %3057 = vmatpush3.msra.mxu0 %v1688_v27 }
 0x44b   : > { %1691 = vrot.lane.b32.xlu0 %v1687_v56, %s3335_s28  ;;  %3058 = vmatprep.subr.mxu0 %v1687_v56 }
 0x44c   : > { %3059 = vmatpush3.msra.mxu0 %v1687_v56 }
 0x44d   : > { %1707 = vrot.lane.b32.xlu1 %v1689_v12, %s3334_s20  ;;  %3061 = vmatmul.mubr.msk.f32.vlgmr.msra.gmra.mxu0 %vm248_vm0, %v3629_v2 }
 0x44e   : > { %3063 = vmatprep.mubr.msk.f32.mxu0 %vm248_vm0, %v3632_v3 }
 0x44f   : > { %1703 = vrot.lane.b32.xlu0 %v1687_v56, %s3334_s20 }
 0x451   : > { %1705 = vrot.lane.b32.xlu1 %v1688_v27, %s3334_s20  ;;  %3064 = vmatmul.mubr.msk.f32.gmra.mxu0 %vm248_vm0, %v3639_v5 }
 0x452   : > { %3088 = vmatprep.mubr.msk.f32.mxu0 %vm248_vm0, %v3642_v7 }
 0x453   : > { %2038 = vperm.xlu0 %3200, %v3647_v15  }
 0x455   : > { %2043 = vperm.xlu1 %3201, %v3655_v17  }
 0x457   : > { %2028 = vperm.xlu0 %3200, %v3663_v18  }
 0x459   : > { %2033 = vperm.xlu1 %3201, %v3669_v19  }
 0x4b3   : > { %v1694_v2 = vpop.permute.xlu0 %1693 }
 0x4b7   : > { %v1698_v3 = vpop.permute.xlu1 %1697 }
 0x4b8   : > { %3066 = vmatprep.subr.msk.mxu1 %vm2738_vm1, %v1698_v3 }
 0x4b9   : > { %3067 = vmatpush3.msk.msra.mxu1 %vm2738_vm1, %v1698_v3  ;;  %v1696_v5 = vpop.permute.xlu0 %1695 }
 0x4ba   : > { %3068 = vmatprep.subr.msk.mxu1 %vm2738_vm1, %v1696_v5 }
 0x4bb   : > { %v1710_v7 = vpop.permute.xlu1 %1709  ;;  %3069 = vmatpush3.msk.msra.mxu1 %vm2738_vm1, %v1696_v5 }
 0x4bc   : > { %3070 = vmatprep.subr.msk.mxu1 %vm2738_vm1, %v1694_v2  ;;  %3080 = vmatprep.subr.msk.mxu0 %vm2739_vm2, %v1710_v7 }
 0x4bd   : > { %3071 = vmatpush3.msk.msra.mxu1 %vm2738_vm1, %v1694_v2  ;;  %v1692_v15 = vpop.permute.xlu0 %1691  ;;  %3081 = vmatpush3.msk.msra.mxu0 %vm2739_vm2, %v1710_v7 }
 0x4be   : > { %3072 = vmatprep.subr.msk.mxu1 %vm2738_vm1, %v1692_v15 }
 0x4bf   : > { %v1708_v17 = vpop.permute.xlu1 %1707  ;;  %3073 = vmatpush3.msk.msra.mxu1 %vm2738_vm1, %v1692_v15 }
 0x4c0   : > { %3075 = vmatmul.mubr.msk.f32.vlgmr.msra.gmra.mxu1 %vm248_vm0, %v3689_v31  ;;  %3082 = vmatprep.subr.msk.mxu0 %vm2739_vm2, %v1708_v17 }
 0x4c1   : > { %3083 = vmatpush3.msk.msra.mxu0 %vm2739_vm2, %v1708_v17  ;;  %3077 = vmatprep.mubr.msk.f32.mxu1 %vm248_vm0, %v3693_v32  ;;  %v1704_v19 = vpop.permute.xlu0 %1703  ;;  %v3202_v17 = vld [vmem:[%s3487_s23 + $0x8] sm:$0xff] }
 0x4c3   : > { %v1706_v18 = vpop.permute.xlu1 %1705 }
 0x4c4   : > { %3078 = vmatmul.mubr.msk.f32.gmra.mxu1 %vm248_vm0, %v3705_v34  ;;  %3084 = vmatprep.subr.msk.mxu0 %vm2739_vm2, %v1706_v18 }
 0x4c5   : > { %3085 = vmatpush3.msk.msra.mxu0 %vm2739_vm2, %v1706_v18  ;;  %3102 = vmatprep.mubr.msk.f32.mxu1 %vm248_vm0, %v3729_v63 }
 0x4c6   : > { %3086 = vmatprep.subr.msk.mxu0 %vm2739_vm2, %v1704_v19 }
 0x4c7   : > { %3087 = vmatpush3.msk.msra.mxu0 %vm2739_vm2, %v1704_v19 }
 0x4c8   : > { %3089 = vmatmul.mubr.msk.f32.vlgmr.msra.gmra.mxu0 %vm248_vm0, %v3713_v37 }
 0x4c9   : > { %3091 = vmatprep.mubr.msk.f32.mxu0 %vm248_vm0, %v3717_v38 }
 0x4cc   : > { %3092 = vmatmul.mubr.msk.f32.gmra.mxu0 %vm248_vm0, %v3725_v39 }
 0x4cd   : > { %3116 = vmatprep.mubr.msk.f32.mxu0 %vm248_vm0, %v3734_v36 }
 0x4ce   : > { %v2039_v39 = vpop.permute.xlu0 %2038 }
 0x4d0   : > { %v2044_v11 = vpop.permute.xlu1 %2043 }
 0x4d2   : > { %v2029_v40 = vpop.permute.xlu0 %2028 }
 0x4d4   : > { %v2034_v37 = vpop.permute.xlu1 %2033 }
 0x50d   : > { %v3062_v31 = vpop.f32.mrf.mxu0 }
 0x50f   : > { %v1801_v32 = vpop.f32.mrf.mxu0 }
 0x511   : > { %v3065_v63 = vpop.f32.mrf.mxu0 }
 0x513   : > { %v1811_v14 = vpop.f32.mrf.mxu0 }
 0x580   : > { %v3076_v34 = vpop.f32.mrf.mxu1 }
 0x581   : > { %v1904_v0 = vadd.f32 %v3076_v34, %v3062_v31 }
 0x582   : > { %v1898_v58 = vpop.f32.mrf.mxu1 }
 0x583   : > { %v1899_v8 = vadd.f32 %v1898_v58, %v1801_v32  ;;  %v3204_v32 = vld [vmem:[%s3487_s23 + $0x18] sm:$0xff] }
 0x584   : > { %v3079_v60 = vpop.f32.mrf.mxu1 }
 0x585   : > { %v1914_v1 = vadd.f32 %v3079_v60, %v3065_v63 }
 0x586   : > { %v1908_v26 = vpop.f32.mrf.mxu1 }
 0x587   : > { %v1909_v36 = vadd.f32 %v1908_v26, %v1811_v14 }
 0x588   : > { %v3090_v20 = vpop.f32.mrf.mxu0 }
 0x589   : > { %v2019_v25 = vadd.f32 %v3090_v20, %v1904_v0 }
 0x58a   : > { %v1999_v38 = vpop.f32.mrf.mxu0 }
 0x58b   : > { %v2047_v6 = vadd.f32 %v2034_v37, %v2019_v25  ;;  %v2018_v24 = vadd.f32 %v1999_v38, %v1899_v8 }
 0x58c   : > { %v3093_v4 = vpop.f32.mrf.mxu0 }
 0x58d   : > { %v2051_v9 = vmax.f32 %v2047_v6, 0.0  ;;  %v2021_v10 = vadd.f32 %v3093_v4, %v1914_v1  ;;  %v2046_v29 = vadd.f32 %v2029_v40, %v2018_v24 }
 0x58e   : > { %v2009_v23 = vpop.f32.mrf.mxu0 }
 0x58f   : > { %v2049_v27 = vadd.f32 %v2044_v11, %v2021_v10  ;;  %v2020_v28 = vadd.f32 %v2009_v23, %v1909_v36  ;;  %2056 = vrot.lane.b32.xlu0 %v2051_v9, %s3335_s28  ;;  %v2050_v30 = vmax.f32 %v2046_v29, 0.0 }
 0x591   : > { %v2053_v33 = vmax.f32 %v2049_v27, 0.0  ;;  %v2048_v35 = vadd.f32 %v2039_v39, %v2020_v28 }
 0x593   : > { %v2052_v41 = vmax.f32 %v2048_v35, 0.0  ;;  %2060 = vrot.lane.b32.xlu1 %v2053_v33, %s3335_s28  ;;  %3094 = vmatprep.subr.mxu1 %v2053_v33 }
 0x594   : > { %3095 = vmatpush3.msra.mxu1 %v2053_v33 }
 0x595   : > { %2058 = vrot.lane.b32.xlu0 %v2052_v41, %s3335_s28  ;;  %3096 = vmatprep.subr.mxu1 %v2052_v41 }
 0x596   : > { %3097 = vmatpush3.msra.mxu1 %v2052_v41 }
 0x597   : > { %2072 = vrot.lane.b32.xlu1 %v2053_v33, %s3334_s20  ;;  %3098 = vmatprep.subr.mxu1 %v2051_v9 }
 0x598   : > { %3099 = vmatpush3.msra.mxu1 %v2051_v9 }
 0x599   : > { %2054 = vrot.lane.b32.xlu0 %v2050_v30, %s3335_s28  ;;  %3100 = vmatprep.subr.mxu1 %v2050_v30 }
 0x59a   : > { %3101 = vmatpush3.msra.mxu1 %v2050_v30 }
 0x59b   : > { %2070 = vrot.lane.b32.xlu1 %v2052_v41, %s3334_s20  ;;  %3103 = vmatmul.mubr.msk.f32.vlgmr.msra.gmra.mxu1 %vm248_vm0, %v3742_v43  ;;  %v2627_v43 = vld [vmem:[%s4140_s2 + $0x58] sm:$0xff] }
 0x59c   : > { %3105 = vmatprep.mubr.msk.f32.mxu1 %vm248_vm0, %v3745_v45  ;;  %v2626_v45 = vld [vmem:[%s4140_s2 + $0x50] sm:$0xff] }
 0x59d   : > { %2066 = vrot.lane.b32.xlu0 %v2050_v30, %s3334_s20 }
 0x59f   : > { %2068 = vrot.lane.b32.xlu1 %v2051_v9, %s3334_s20  ;;  %3106 = vmatmul.mubr.msk.f32.gmra.mxu1 %vm248_vm0, %v3755_v47  ;;  %s4071_s20 = scalar_lea.vmem [#allocation7], %s2533_s27 }
 0x5a0   : > { %3130 = vmatprep.mubr.msk.f32.mxu1 %vm248_vm0, %v3758_v48  ;;  %s2441_s27 = sshll.u32 %s4071_s20, 4  ;;  %s4086_s27 = int_to_ptr.vmem [resolvable:$true] %s2441_s27 }
 0x5a1   : > { %1294 = vperm.xlu0 %3200, %v2625_v53   ;;  %p3267_p11 = scmp.lt.s32.totalorder %s4086_s27, %s3265_s17 }
 0x5a3   : > { %1289 = vperm.xlu1 %3201, %v2624_v50  }
 0x5a5   : > { %1304 = vperm.xlu0 %3200, %v2627_v43  }
 0x5a7   : > { %1299 = vperm.xlu1 %3201, %v2626_v45  }
 0x5a9   : > { %2396 = vperm.xlu0 %3200, %v2625_v53  }
 0x5ab   : > { %2391 = vperm.xlu1 %3201, %v2624_v50  }
 0x5ad   : > { %2406 = vperm.xlu0 %3200, %v2627_v43  }
 0x5af   : > { %2401 = vperm.xlu1 %3201, %v2626_v45  }
 0x601   : > { %v2057_v47 = vpop.permute.xlu0 %2056 }
 0x605   : > { %v2061_v55 = vpop.permute.xlu1 %2060 }
 0x606   : > { %3108 = vmatprep.subr.msk.mxu0 %vm2738_vm1, %v2061_v55 }
 0x607   : > { %3109 = vmatpush3.msk.msra.mxu0 %vm2738_vm1, %v2061_v55  ;;  %v2059_v48 = vpop.permute.xlu0 %2058 }
 0x608   : > { %3110 = vmatprep.subr.msk.mxu0 %vm2738_vm1, %v2059_v48 }
 0x609   : > { %v2073_v12 = vpop.permute.xlu1 %2072  ;;  %3111 = vmatpush3.msk.msra.mxu0 %vm2738_vm1, %v2059_v48 }
 0x60a   : > { %3112 = vmatprep.subr.msk.mxu0 %vm2738_vm1, %v2057_v47  ;;  %3122 = vmatprep.subr.msk.mxu1 %vm2739_vm2, %v2073_v12 }
 0x60b   : > { %3113 = vmatpush3.msk.msra.mxu0 %vm2738_vm1, %v2057_v47  ;;  %v2055_v56 = vpop.permute.xlu0 %2054  ;;  %3123 = vmatpush3.msk.msra.mxu1 %vm2739_vm2, %v2073_v12 }
 0x60c   : > { %3114 = vmatprep.subr.msk.mxu0 %vm2738_vm1, %v2055_v56 }
 0x60d   : > { %v2071_v2 = vpop.permute.xlu1 %2070  ;;  %3115 = vmatpush3.msk.msra.mxu0 %vm2738_vm1, %v2055_v56 }
 0x60e   : > { %3117 = vmatmul.mubr.msk.f32.vlgmr.msra.gmra.mxu0 %vm248_vm0, %v3809_v13  ;;  %3124 = vmatprep.subr.msk.mxu1 %vm2739_vm2, %v2071_v2 }
 0x60f   : > { %3125 = vmatpush3.msk.msra.mxu1 %vm2739_vm2, %v2071_v2  ;;  %3119 = vmatprep.mubr.msk.f32.mxu0 %vm248_vm0, %v3823_v59  ;;  %v2067_v5 = vpop.permute.xlu0 %2066 }
 0x611   : > { %v2069_v3 = vpop.permute.xlu1 %2068 }
 0x612   : > { %3120 = vmatmul.mubr.msk.f32.gmra.mxu0 %vm248_vm0, %v3831_v61  ;;  %3126 = vmatprep.subr.msk.mxu1 %vm2739_vm2, %v2069_v3 }
 0x613   : > { %3127 = vmatpush3.msk.msra.mxu1 %vm2739_vm2, %v2069_v3 }
 0x614   : > { %3128 = vmatprep.subr.msk.mxu1 %vm2739_vm2, %v2067_v5 }
 0x615   : > { %3129 = vmatpush3.msk.msra.mxu1 %vm2739_vm2, %v2067_v5 }
 0x616   : > { %3131 = vmatmul.mubr.msk.f32.vlgmr.msra.gmra.mxu1 %vm248_vm0, %v3833_v62 }
 0x617   : > { %3133 = vmatprep.mubr.msk.f32.mxu1 %vm248_vm0, %v3848_v21  ;;  %v3203_v21 = vld [vmem:[%s3487_s23] sm:$0xff] }
 0x61a   : > { %3134 = vmatmul.mubr.msk.f32.gmra.mxu1 %vm248_vm0, %v3856_v22 }
 0x61c   : > { %v1295_v13 = vpop.permute.xlu0 %1294 }
 0x61d   : > { %v1308_v59 = vadd.f32 %v1295_v13, %v3917_v44 }
 0x61e   : > { %v1290_v61 = vpop.permute.xlu1 %1289 }
 0x61f   : > { %v1312_v7 = vmax.f32 %v1308_v59, 0.0  ;;  %v1307_v16 = vadd.f32 %v1290_v61, %v3919_v42 }
 0x620   : > { %v1305_v15 = vpop.permute.xlu0 %1304 }
 0x621   : > { %v1316_v18 = vadd.f32 %v3202_v17, %v1312_v7  ;;  %v1311_v62 = vmax.f32 %v1307_v16, 0.0  ;;  %v1310_v19 = vadd.f32 %v1305_v15, %v3921_v54  ;;  %v3205_v54 = vld [vmem:[%s3487_s23 + $0x10] sm:$0xff]  ;;  %s2737_s23 = sshll.u32 %s3381_s16, 10  ;;  %s3260_s16 = scalar_lea.vmem %s4086_s27, 1024 }
 0x622   : > { %v1300_v31 = vpop.permute.xlu1 %1299  ;;  %s4093_s30 = scalar_lea.hbm %s4141_s3, %s2737_s23  ;;  %p3261_p3 = scmp.ne.s32.totalorder %s4086_s27, %s3260_s16 }
 0x623   : > { %1320 = vst [vmem:[%s4071_s20 + $0x8] sm:$0xff] %v1316_v18  ;;  %v1315_v22 = vadd.f32 %v3203_v21, %v1311_v62  ;;  %v1314_v44 = vmax.f32 %v1310_v19, 0.0  ;;  %v1309_v42 = vadd.f32 %v1300_v31, %v3923_v57  ;;  %p3268_p12 = scmp.lt.s32.totalorder %s3266_s22, %s3260_s16 }
 0x624   : > { %v2397_v38 = vpop.permute.xlu0 %2396  ;;  %p3262_p7 = pnand %p3261_p3, %p4157_p10 }
 0x625   : > { %1319 = vst [vmem:[%s4071_s20] sm:$0xff] %v1315_v22  ;;  %v1318_v34 = vadd.f32 %v3204_v32, %v1314_v44  ;;  %v1313_v63 = vmax.f32 %v1309_v42, 0.0  ;;  %p3269_p13 = por %p3268_p12, %p3267_p11 }
 0x626   : > { %v2392_v6 = vpop.permute.xlu1 %2391  ;;  %p3263_p9 = pneg %p3262_p7 }
 0x627   : > { %1322 = vst [vmem:[%s4071_s20 + $0x18] sm:$0xff] %v1318_v34  ;;  %v1317_v58 = vadd.f32 %v3205_v54, %v1313_v63 }
 0x628   : > { %v2407_v35 = vpop.permute.xlu0 %2406  ;;  %p3270_p0 = pnand %p3269_p13, %p3263_p9 }
 0x629   : > { %1321 = vst [vmem:[%s4071_s20 + $0x10] sm:$0xff] %v1317_v58 }
 0x62a   : > { %v2402_v50 = vpop.permute.xlu1 %2401 }
 0x65b   : > { %v3104_v11 = vpop.f32.mrf.mxu1 }
 0x65d   : > { %v2164_v14 = vpop.f32.mrf.mxu1 }
 0x65f   : > { %v3107_v20 = vpop.f32.mrf.mxu1 }
 0x661   : > { %v2174_v25 = vpop.f32.mrf.mxu1 }
 0x6ce   : > { %v3118_v60 = vpop.f32.mrf.mxu0 }
 0x6cf   : > { %v2267_v26 = vadd.f32 %v3118_v60, %v3104_v11 }
 0x6d0   : > { %v2261_v0 = vpop.f32.mrf.mxu0 }
 0x6d1   : > { %v2262_v57 = vadd.f32 %v2261_v0, %v2164_v14 }
 0x6d2   : > { %v3121_v37 = vpop.f32.mrf.mxu0 }
 0x6d3   : > { %v2277_v36 = vadd.f32 %v3121_v37, %v3107_v20 }
 0x6d4   : > { %v2271_v4 = vpop.f32.mrf.mxu0 }
 0x6d5   : > { %v2272_v24 = vadd.f32 %v2271_v4, %v2174_v25 }
 0x6d6   : > { %v3132_v1 = vpop.f32.mrf.mxu1 }
 0x6d7   : > { %v2382_v39 = vadd.f32 %v3132_v1, %v2267_v26 }
 0x6d8   : > { %v2362_v8 = vpop.f32.mrf.mxu1 }
 0x6d9   : > { %v2410_v9 = vadd.f32 %v2397_v38, %v2382_v39  ;;  %v2381_v10 = vadd.f32 %v2362_v8, %v2262_v57 }
 0x6da   : > { %v3135_v23 = vpop.f32.mrf.mxu1 }
 0x6db   : > { %v2414_v27 = vmax.f32 %v2410_v9, 0.0  ;;  %v2409_v28 = vadd.f32 %v2392_v6, %v2381_v10  ;;  %v2384_v33 = vadd.f32 %v3135_v23, %v2277_v36 }
 0x6dc   : > { %v2372_v40 = vpop.f32.mrf.mxu1 }
 0x6dd   : > { %v2418_v29 = vadd.f32 %v3772_v51, %v2414_v27  ;;  %v2413_v41 = vmax.f32 %v2409_v28, 0.0  ;;  %v2412_v30 = vadd.f32 %v2407_v35, %v2384_v33  ;;  %v2383_v53 = vadd.f32 %v2372_v40, %v2272_v24 }
 0x6df   : > { %2725 = vst [vmem:[%s4071_s20 + $0x28] sm:$0xff] %v2418_v29  ;;  %v2417_v43 = vadd.f32 %v3779_v52, %v2413_v41  ;;  %v2416_v45 = vmax.f32 %v2412_v30, 0.0  ;;  %v2411_v47 = vadd.f32 %v2402_v50, %v2383_v53 }
 0x6e1   : > { %2724 = vst [vmem:[%s4071_s20 + $0x20] sm:$0xff] %v2417_v43  ;;  %v2420_v51 = vadd.f32 %v3751_v46, %v2416_v45  ;;  %v2415_v55 = vmax.f32 %v2411_v47, 0.0 }
 0x6e3   : > { %2727 = vst [vmem:[%s4071_s20 + $0x38] sm:$0xff] %v2420_v51  ;;  %v2419_v52 = vadd.f32 %v3761_v49, %v2415_v55 }
 0x6e5   : > { %2726 = vst [vmem:[%s4071_s20 + $0x30] sm:$0xff] %v2419_v52 }
 0x6e6   : > { %3273 = shalt.err (!%p3270_p0)
}
 0x6e7   : > { %s3274_s25 = scalar_lea.hbm %s4093_s30, 1024  ;;  %s3278_s8 = scalar_lea.hbm %s4141_s3, 4096 }
 0x6e8   : > { %p3275_p5 = scmp.ne.s32.totalorder %s4093_s30, %s3274_s25  ;;  %p3279_p4 = scmp.lt.s32.totalorder %s4093_s30, %s4141_s3 }
 0x6e9   : > { %p3280_p6 = scmp.lt.s32.totalorder %s3278_s8, %s3274_s25 }
 0x6ea   : > { %p3276_p2 = pnand %p3275_p5, %p4157_p10 }
 0x6eb   : > { %p3281_p8 = por %p3280_p6, %p3279_p4 }
 0x6ec   : > { %p3277_p1 = pneg %p3276_p2 }
 0x6ee   : > { %p3282_p3 = pnand %p3281_p8, %p3277_p1 }
 0x6f0   : > { %3285 = shalt.err (!%p3282_p3)
}
 0x6f1   : > { %s3338_s10 = smov 128   ;;  %s3339_s20 = smov 8  }
 0x6f2   : > { %3142 = dma.vmem_to_hbm [thread:$0]  (%p4157_p10), %s4086_s27, 1024, %s4093_s30, %s2427_s18, %s3338_s10, %s3338_s10, %s3339_s20  }
 0x6f3 PF: > { %p3159_p7 = scmp.ge.s32.totalorder %s3328_s15, 2  ;;  %s2456_s23 = sand.u32 1, %s3316_s12  }
 0x6f4   : > { %p4158_p9 = scmp.ne.s32.totalorder %s4147_s19, 0  ;;  %s2457_s11 = scalar_lea.sflag [#allocation4], %s2456_s23 }
 0x6f6   : > { %p3153_p11 = pnand %p3159_p7, %p4158_p9 }
 0x6f8   : > { %p3154_p12 = pneg %p3153_p11 }
 0x6fa   : > { %3311 = dma.done.wait (%p3154_p12), %s2457_s11, 1024  }
 0x6fb   : > { %3313 = vsyncadd (%p3154_p12), %s2457_s11, 4294966272  ;;  %p17_p13 = scmp.ge.s32.totalorder %s3413_s24, 6   ;;  %s4159_s12 = smov %s3320_s13 }
 0x6fc   : > { %s4160_s13 = smov %s3324_s14  ;;  %s4161_s14 = smov %s3433_s5 }
 0x6fd   : > { %s4162_s15 = smov %s3413_s24  ;;  %19 = sbr.rel (!%p17_p13) target bundleno = 6 (0x6), region = 93 }
 0x702   :  { %2462 = vsyncpa [#allocation3], 1 }
 0x703   :  { %2464 = vsyncpa [#allocation3 + $0x1], 1 }
 0x704   :  { %2465 = vsyncpa [#allocation6], 1 }
 0x705   :  { %2466 = vsyncpa [#allocation4], 1 }
 0x706   :  { %2468 = vsyncpa [#allocation4 + $0x1], 1 }

</bundles_post_ra>
